<compile_context>
chip_gen: v6e
topology: v6e:2x2x1
jax: 0.10.0
libtpu: 0.0.40
codegen_flags: <defaults>
</compile_context>

<pallas_src>
import functools
import math

import jax
import jax.numpy as jnp
from jax.experimental import pallas as pl
from jax.experimental.pallas import tpu as pltpu

# ----------------------------- configuration ------------------------------
FEATURE_VECTOR_SIZE = 4
D_IN = 3
D_OUT = 1
HIDDEN = [32, 32, 32]
SKIP_IN = (2,)
BIAS = 1.0

DIMS = [D_IN] + HIDDEN + [D_OUT + FEATURE_VECTOR_SIZE]   # [3, 32, 32, 32, 5]
NUM_LAYERS = len(DIMS)                                   # 5
D_H0 = DIMS[1]                                           # 32 (lin0 out)
D_SKIP = DIMS[2] - DIMS[0]                               # 29 (lin1 out)
D_FINAL = DIMS[-1]                                       # 5

INV_SQRT2 = 1.0 / math.sqrt(2.0)
SOFTPLUS_BETA = 100.0
SOFTPLUS_INV_BETA = 1.0 / SOFTPLUS_BETA
SOFTPLUS_THRESHOLD = 20.0


def _softplus100(z, compute_dtype=jnp.float32):
    # PyTorch nn.Softplus(beta=100): (1/beta)*log1p(exp(beta*z)); linear for
    # beta*z > 20.  Multiply by 1/beta (not divide) so no extra EUP-class op.
    z = z.astype(compute_dtype)
    bz = z * SOFTPLUS_BETA
    safe = jnp.minimum(bz, SOFTPLUS_THRESHOLD)
    return jnp.where(bz > SOFTPLUS_THRESHOLD, z,
                     jnp.log1p(jnp.exp(safe)) * SOFTPLUS_INV_BETA)


def _round_up(v, m):
    return ((v + m - 1) // m) * m


def _bf16_eup_supported():
    """bf16 VPU/EUP exists on v6e/v7x; v5e and older only add converts."""
    try:
        if jax.default_backend() != "tpu":
            return False
        kind = jax.devices()[0].device_kind.lower()
    except Exception:
        return False
    for old in ("v2", "v3", "v4", "v5"):
        if old in kind:
            return False
    return True


def weight_norm_effective(v, g):
    """nn.utils.weight_norm: W = g * v / ||v||_row.  At this module's init
    g == ||v|| so W == v; fold trained checkpoints through this helper."""
    g = jnp.reshape(g, (-1, 1))
    return v * (g / jnp.linalg.norm(v, axis=1, keepdims=True))


# ------------------------------ Pallas kernel ------------------------------
def _implicit_mlp_kernel(x_ref, wx_ref, b0_ref, w1_ref, b1_ref,
                         w2a_ref, b2_ref, w3_ref, b3_ref, o_ref,
                         *, act_dtype, mxu_dtype):
    # Feature-major layout: activations are (features, TN) so the point axis
    # maps to the 128-wide lane dimension (TN % 128 == 0, lane-dense stores).
    x = x_ref[...].astype(mxu_dtype)                               # (3, TN)

    # Fused K=3 projections: rows 0:32 -> lin0 pre-activation, rows 32:64 ->
    # lin2's (x/sqrt(2)) contribution (the 1/sqrt(2) is folded into wx rows).
    zx = jnp.dot(wx_ref[...], x, preferred_element_type=jnp.float32)  # (64, TN)
    x_proj2 = zx[D_H0:, :]                                         # (32, TN)

    h = _softplus100(zx[:D_H0, :] + b0_ref[...], act_dtype)        # (32, TN)

    h = _softplus100(
        jnp.dot(w1_ref[...], h.astype(mxu_dtype),
                preferred_element_type=jnp.float32) + b1_ref[...],
        act_dtype)                                                 # (29, TN)

    # Skip layer: lin2(cat([h, x], 1)/sqrt(2)) = w2a@h + (w2b/sqrt2)@x + b2,
    # with the x half already computed above (bias left unscaled).
    h = _softplus100(
        jnp.dot(w2a_ref[...], h.astype(mxu_dtype),
                preferred_element_type=jnp.float32) + x_proj2 + b2_ref[...],
        act_dtype)                                                 # (32, TN)

    out = (jnp.dot(w3_ref[...], h.astype(mxu_dtype),
                   preferred_element_type=jnp.float32) + b3_ref[...])  # (5, TN)
    o_ref[...] = out.astype(o_ref.dtype)


# --------------------------------- wrapper ----------------------------------
@functools.partial(
    jax.jit,
    static_argnames=("tile_n", "feature_major_output", "mxu_bf16", "eup_bf16"))
def implicit_network_forward(x, params, *, tile_n=8192,
                             feature_major_output=False,
                             mxu_bf16=True, eup_bf16=None):
    """x: (N, 3) float32.  Returns (N, 5) float32 (or (5, N) if
    feature_major_output=True, skipping the output transpose)."""
    N, d_in = x.shape
    assert d_in == D_IN

    if eup_bf16 is None:
        eup_bf16 = _bf16_eup_supported()
    act_dtype = jnp.bfloat16 if eup_bf16 else jnp.float32
    mxu_dtype = jnp.bfloat16 if mxu_bf16 else jnp.float32

    (w0, b0), (w1, b1), (w2, b2), (w3, b3) = params   # w: (out, in)

    # Fold 1/sqrt(2) of the skip concat into the lin2 weight halves, and fuse
    # the two K=3 projections (lin0, lin2's x-part) into one (64, 3) weight.
    w2a = w2[:, :D_SKIP] * INV_SQRT2                  # (32, 29) acts on h
    w2b = w2[:, D_SKIP:] * INV_SQRT2                  # (32, 3)  acts on x
    wx = jnp.concatenate([w0, w2b], axis=0)           # (64, 3)
    wx_m, w1_m, w2a_m, w3_m = (w.astype(mxu_dtype) for w in (wx, w1, w2a, w3))
    # Biases as f32 column vectors so they broadcast along the lane axis.
    b0c, b1c, b2c, b3c = (b.reshape(-1, 1).astype(jnp.float32)
                          for b in (b0, b1, b2, b3))

    # Point tile: multiple of 128 (lane-dense), big enough to amortize the
    # ~0.35us per-grid-step overhead, small enough to keep >=2 "parallel"
    # grid steps (v7x megacore) and stay well inside VMEM.
    tile = _round_up(max(128, tile_n), 128)
    tile = max(128, min(tile, _round_up((N + 1) // 2, 128)))

    # Feature-major input; transpose + pad fuse into one HBM pass under jit.
    xt = x.T                                          # (3, N)
    n_pad = (-N) % tile
    if n_pad:
        xt = jnp.pad(xt, ((0, 0), (0, n_pad)))
    Np = N + n_pad
    grid = (Np // tile,)

    def full_spec(arr):
        return pl.BlockSpec(arr.shape, lambda i: (0,) * arr.ndim)

    out_t = pl.pallas_call(
        functools.partial(_implicit_mlp_kernel,
                          act_dtype=act_dtype, mxu_dtype=mxu_dtype),
        out_shape=jax.ShapeDtypeStruct((D_FINAL, Np), jnp.float32),
        grid_spec=pltpu.PrefetchScalarGridSpec(
            num_scalar_prefetch=0,
            grid=grid,
            in_specs=[
                pl.BlockSpec((D_IN, tile), lambda i: (0, i)),   # x tile (3, TN)
                full_spec(wx_m), full_spec(b0c),
                full_spec(w1_m), full_spec(b1c),
                full_spec(w2a_m), full_spec(b2c),
                full_spec(w3_m), full_spec(b3c),
            ],
            out_specs=pl.BlockSpec((D_FINAL, tile), lambda i: (0, i)),
        ),
        compiler_params=pltpu.CompilerParams(
            dimension_semantics=("parallel",),
            vmem_limit_bytes=48 * 1024 * 1024),
        cost_estimate=pl.CostEstimate(
            flops=4416 * Np, transcendentals=186 * Np, bytes_accessed=32 * Np),
    )(xt, wx_m, b0c, w1_m, b1c, w2a_m, b2c, w3_m, b3c)

    if feature_major_output:
        return out_t[:, :N]          # (5, N), lane-dense, no extra HBM pass
    return out_t[:, :N].T            # (N, 5), points-major like PyTorch


# ---------------------- deterministic parameter init -----------------------
def init_params(key):
    """Geometric init (multires=0 branch) exactly as in ImplicitNetwork.__init__.
    weight_norm at init is an identity reparameterization, so v is used as W."""
    params = []
    for l in range(NUM_LAYERS - 1):
        in_dim = DIMS[l]
        if l + 1 in SKIP_IN:
            out_dim = DIMS[l + 1] - DIMS[0]
        else:
            out_dim = DIMS[l + 1]
        key, wk = jax.random.split(key)
        if l == NUM_LAYERS - 2:
            mean = math.sqrt(math.pi) / math.sqrt(DIMS[l])
            w = mean + 1e-4 * jax.random.normal(wk, (out_dim, in_dim), jnp.float32)
            b = jnp.full((out_dim,), -BIAS, jnp.float32)
        else:
            std = math.sqrt(2.0) / math.sqrt(out_dim)
            w = std * jax.random.normal(wk, (out_dim, in_dim), jnp.float32)
            b = jnp.zeros((out_dim,), jnp.float32)
        params.append((w, b))
    return params


# ------------------------------ JAX reference -------------------------------
def reference_forward(x, params):
    inp = x
    h = x
    for l in range(NUM_LAYERS - 1):
        w, b = params[l]
        if l in SKIP_IN:
            h = jnp.concatenate([h, inp], axis=1) * INV_SQRT2
        h = h @ w.T + b
        if l < NUM_LAYERS - 2:
            h = _softplus100(h, jnp.float32)
    return h


# ---------------------------------- main ------------------------------------
if __name__ == "__main__":
    key = jax.random.PRNGKey(0)
    pkey, xkey = jax.random.split(key)
    params = init_params(pkey)

    # Small, non-multiple-of-128 point count: exercises padding, tile clamping
    # (tile -> 512) and a 2-step "parallel" grid.
    N = 1000
    x = jax.random.normal(xkey, (N, D_IN), jnp.float32)

    ref = reference_forward(x, params)

    # Exact f32 path: tight tolerance.
    out_f32 = implicit_network_forward(x, params, mxu_bf16=False, eup_bf16=False)
    out_f32 = jax.block_until_ready(out_f32)
    assert out_f32.shape == (N, D_OUT + FEATURE_VECTOR_SIZE)
    assert jnp.allclose(out_f32, ref, atol=1e-4, rtol=1e-4), "f32 mismatch vs reference"

    # Fast path: bf16 MXU operands (+ bf16 softplus on EUP-bf16 chips).
    out_fast = implicit_network_forward(x, params)
    out_fast = jax.block_until_ready(out_fast)
    assert out_fast.shape == (N, D_OUT + FEATURE_VECTOR_SIZE)
    assert jnp.allclose(out_fast, ref, atol=5e-2, rtol=5e-2), "bf16 mismatch vs reference"

    print("KERNEL_OK")
</pallas_src>

<mosaic_0001>
module attributes {stable_mosaic.version = 11 : i64} {
  func.func @_implicit_mlp_kernel(%arg0: i32, %arg1: memref<3x512xf32, #tpu.memory_space<vmem>>, %arg2: memref<64x3xf32, #tpu.memory_space<vmem>>, %arg3: memref<32x1xf32, #tpu.memory_space<vmem>>, %arg4: memref<29x32xf32, #tpu.memory_space<vmem>>, %arg5: memref<29x1xf32, #tpu.memory_space<vmem>>, %arg6: memref<32x29xf32, #tpu.memory_space<vmem>>, %arg7: memref<32x1xf32, #tpu.memory_space<vmem>>, %arg8: memref<5x32xf32, #tpu.memory_space<vmem>>, %arg9: memref<5x1xf32, #tpu.memory_space<vmem>>, %arg10: memref<5x512xf32, #tpu.memory_space<vmem>>) attributes {dimension_semantics = [#tpu.dimension_semantics<parallel>], iteration_bounds = array<i64: 2>, scalar_prefetch = 0 : i64, scratch_operands = 0 : i64, tpu.core_type = #tpu.core_type<tc>, window_params = [{transform_indices = @transform_0, window_bounds = array<i64: 3, 512>}, {pipeline_mode = #tpu.pipeline_mode<synchronous>, transform_indices = @transform_1, window_bounds = array<i64: 64, 3>}, {pipeline_mode = #tpu.pipeline_mode<synchronous>, transform_indices = @transform_2, window_bounds = array<i64: 32, 1>}, {pipeline_mode = #tpu.pipeline_mode<synchronous>, transform_indices = @transform_3, window_bounds = array<i64: 29, 32>}, {pipeline_mode = #tpu.pipeline_mode<synchronous>, transform_indices = @transform_4, window_bounds = array<i64: 29, 1>}, {pipeline_mode = #tpu.pipeline_mode<synchronous>, transform_indices = @transform_5, window_bounds = array<i64: 32, 29>}, {pipeline_mode = #tpu.pipeline_mode<synchronous>, transform_indices = @transform_6, window_bounds = array<i64: 32, 1>}, {pipeline_mode = #tpu.pipeline_mode<synchronous>, transform_indices = @transform_7, window_bounds = array<i64: 5, 32>}, {pipeline_mode = #tpu.pipeline_mode<synchronous>, transform_indices = @transform_8, window_bounds = array<i64: 5, 1>}, {transform_indices = @transform_9, window_bounds = array<i64: 5, 512>}]} {
    %c0 = arith.constant 0 : index
    %c0_0 = arith.constant 0 : index
    %0 = vector.load %arg1[%c0, %c0_0] : memref<3x512xf32, #tpu.memory_space<vmem>>, vector<3x512xf32>
    %c0_1 = arith.constant 0 : index
    %c0_2 = arith.constant 0 : index
    %1 = vector.load %arg2[%c0_1, %c0_2] : memref<64x3xf32, #tpu.memory_space<vmem>>, vector<64x3xf32>
    %cst = arith.constant dense<0.000000e+00> : vector<64x512xf32>
    %2 = tpu.matmul %1, %0, %cst {dimension_numbers = #tpu.dot_dimension_numbers<[1], [0], [0], [1], [0, 0, 1, 1], [], []>} : vector<64x3xf32>, vector<3x512xf32>, vector<64x512xf32> -> vector<64x512xf32>
    %3 = vector.extract_strided_slice %2 {offsets = [32, 0], sizes = [32, 512], strides = [1, 1]} : vector<64x512xf32> to vector<32x512xf32>
    %4 = vector.extract_strided_slice %2 {offsets = [0, 0], sizes = [32, 512], strides = [1, 1]} : vector<64x512xf32> to vector<32x512xf32>
    %c0_3 = arith.constant 0 : index
    %c0_4 = arith.constant 0 : index
    %5 = vector.load %arg3[%c0_3, %c0_4] : memref<32x1xf32, #tpu.memory_space<vmem>>, vector<32x1xf32>
    %6 = vector.broadcast %5 : vector<32x1xf32> to vector<32x512xf32>
    %7 = arith.addf %4, %6 : vector<32x512xf32>
    %cst_5 = arith.constant 1.000000e+02 : f32
    %8 = vector.broadcast %cst_5 : f32 to vector<32x512xf32>
    %9 = arith.mulf %7, %8 : vector<32x512xf32>
    %cst_6 = arith.constant 2.000000e+01 : f32
    %10 = vector.broadcast %cst_6 : f32 to vector<32x512xf32>
    %11 = arith.minimumf %9, %10 : vector<32x512xf32>
    %cst_7 = arith.constant 2.000000e+01 : f32
    %12 = vector.broadcast %cst_7 : f32 to vector<32x512xf32>
    %13 = arith.cmpf ogt, %9, %12 : vector<32x512xf32>
    %14 = math.exp %11 : vector<32x512xf32>
    %15 = math.log1p %14 : vector<32x512xf32>
    %cst_8 = arith.constant 0.00999999977 : f32
    %16 = vector.broadcast %cst_8 : f32 to vector<32x512xf32>
    %17 = arith.mulf %15, %16 : vector<32x512xf32>
    %18 = arith.select %13, %7, %17 : vector<32x512xi1>, vector<32x512xf32>
    %c0_9 = arith.constant 0 : index
    %c0_10 = arith.constant 0 : index
    %19 = vector.load %arg4[%c0_9, %c0_10] : memref<29x32xf32, #tpu.memory_space<vmem>>, vector<29x32xf32>
    %cst_11 = arith.constant dense<0.000000e+00> : vector<29x512xf32>
    %20 = tpu.matmul %19, %18, %cst_11 {dimension_numbers = #tpu.dot_dimension_numbers<[1], [0], [0], [1], [0, 0, 1, 1], [], []>} : vector<29x32xf32>, vector<32x512xf32>, vector<29x512xf32> -> vector<29x512xf32>
    %c0_12 = arith.constant 0 : index
    %c0_13 = arith.constant 0 : index
    %21 = vector.load %arg5[%c0_12, %c0_13] : memref<29x1xf32, #tpu.memory_space<vmem>>, vector<29x1xf32>
    %22 = vector.broadcast %21 : vector<29x1xf32> to vector<29x512xf32>
    %23 = arith.addf %20, %22 : vector<29x512xf32>
    %cst_14 = arith.constant 1.000000e+02 : f32
    %24 = vector.broadcast %cst_14 : f32 to vector<29x512xf32>
    %25 = arith.mulf %23, %24 : vector<29x512xf32>
    %cst_15 = arith.constant 2.000000e+01 : f32
    %26 = vector.broadcast %cst_15 : f32 to vector<29x512xf32>
    %27 = arith.minimumf %25, %26 : vector<29x512xf32>
    %cst_16 = arith.constant 2.000000e+01 : f32
    %28 = vector.broadcast %cst_16 : f32 to vector<29x512xf32>
    %29 = arith.cmpf ogt, %25, %28 : vector<29x512xf32>
    %30 = math.exp %27 : vector<29x512xf32>
    %31 = math.log1p %30 : vector<29x512xf32>
    %cst_17 = arith.constant 0.00999999977 : f32
    %32 = vector.broadcast %cst_17 : f32 to vector<29x512xf32>
    %33 = arith.mulf %31, %32 : vector<29x512xf32>
    %34 = arith.select %29, %23, %33 : vector<29x512xi1>, vector<29x512xf32>
    %c0_18 = arith.constant 0 : index
    %c0_19 = arith.constant 0 : index
    %35 = vector.load %arg6[%c0_18, %c0_19] : memref<32x29xf32, #tpu.memory_space<vmem>>, vector<32x29xf32>
    %cst_20 = arith.constant dense<0.000000e+00> : vector<32x512xf32>
    %36 = tpu.matmul %35, %34, %cst_20 {dimension_numbers = #tpu.dot_dimension_numbers<[1], [0], [0], [1], [0, 0, 1, 1], [], []>} : vector<32x29xf32>, vector<29x512xf32>, vector<32x512xf32> -> vector<32x512xf32>
    %37 = arith.addf %36, %3 : vector<32x512xf32>
    %c0_21 = arith.constant 0 : index
    %c0_22 = arith.constant 0 : index
    %38 = vector.load %arg7[%c0_21, %c0_22] : memref<32x1xf32, #tpu.memory_space<vmem>>, vector<32x1xf32>
    %39 = vector.broadcast %38 : vector<32x1xf32> to vector<32x512xf32>
    %40 = arith.addf %37, %39 : vector<32x512xf32>
    %cst_23 = arith.constant 1.000000e+02 : f32
    %41 = vector.broadcast %cst_23 : f32 to vector<32x512xf32>
    %42 = arith.mulf %40, %41 : vector<32x512xf32>
    %cst_24 = arith.constant 2.000000e+01 : f32
    %43 = vector.broadcast %cst_24 : f32 to vector<32x512xf32>
    %44 = arith.minimumf %42, %43 : vector<32x512xf32>
    %cst_25 = arith.constant 2.000000e+01 : f32
    %45 = vector.broadcast %cst_25 : f32 to vector<32x512xf32>
    %46 = arith.cmpf ogt, %42, %45 : vector<32x512xf32>
    %47 = math.exp %44 : vector<32x512xf32>
    %48 = math.log1p %47 : vector<32x512xf32>
    %cst_26 = arith.constant 0.00999999977 : f32
    %49 = vector.broadcast %cst_26 : f32 to vector<32x512xf32>
    %50 = arith.mulf %48, %49 : vector<32x512xf32>
    %51 = arith.select %46, %40, %50 : vector<32x512xi1>, vector<32x512xf32>
    %c0_27 = arith.constant 0 : index
    %c0_28 = arith.constant 0 : index
    %52 = vector.load %arg8[%c0_27, %c0_28] : memref<5x32xf32, #tpu.memory_space<vmem>>, vector<5x32xf32>
    %cst_29 = arith.constant dense<0.000000e+00> : vector<5x512xf32>
    %53 = tpu.matmul %52, %51, %cst_29 {dimension_numbers = #tpu.dot_dimension_numbers<[1], [0], [0], [1], [0, 0, 1, 1], [], []>} : vector<5x32xf32>, vector<32x512xf32>, vector<5x512xf32> -> vector<5x512xf32>
    %c0_30 = arith.constant 0 : index
    %c0_31 = arith.constant 0 : index
    %54 = vector.load %arg9[%c0_30, %c0_31] : memref<5x1xf32, #tpu.memory_space<vmem>>, vector<5x1xf32>
    %55 = vector.broadcast %54 : vector<5x1xf32> to vector<5x512xf32>
    %56 = arith.addf %53, %55 : vector<5x512xf32>
    %c0_32 = arith.constant 0 : index
    %c0_33 = arith.constant 0 : index
    %57 = vector.load %arg10[%c0_32, %c0_33] : memref<5x512xf32, #tpu.memory_space<vmem>>, vector<5x512xf32>
    tpu.vector_store %arg10[%c0_32, %c0_33], %56 {strides = array<i32>} : memref<5x512xf32, #tpu.memory_space<vmem>>, vector<5x512xf32>,
    return
  }
  func.func @transform_0(%arg0: i32) -> (i32, i32) {
    %c0_i32 = arith.constant 0 : i32
    %c0_i32_0 = arith.constant 0 : i32
    return %c0_i32, %arg0 : i32, i32
  }
  func.func @transform_1(%arg0: i32) -> (i32, i32) {
    %c0_i32 = arith.constant 0 : i32
    %c0_i32_0 = arith.constant 0 : i32
    %c0_i32_1 = arith.constant 0 : i32
    return %c0_i32, %c0_i32_0 : i32, i32
  }
  func.func @transform_2(%arg0: i32) -> (i32, i32) {
    %c0_i32 = arith.constant 0 : i32
    %c0_i32_0 = arith.constant 0 : i32
    %c0_i32_1 = arith.constant 0 : i32
    return %c0_i32, %c0_i32_0 : i32, i32
  }
  func.func @transform_3(%arg0: i32) -> (i32, i32) {
    %c0_i32 = arith.constant 0 : i32
    %c0_i32_0 = arith.constant 0 : i32
    %c0_i32_1 = arith.constant 0 : i32
    return %c0_i32, %c0_i32_0 : i32, i32
  }
  func.func @transform_4(%arg0: i32) -> (i32, i32) {
    %c0_i32 = arith.constant 0 : i32
    %c0_i32_0 = arith.constant 0 : i32
    %c0_i32_1 = arith.constant 0 : i32
    return %c0_i32, %c0_i32_0 : i32, i32
  }
  func.func @transform_5(%arg0: i32) -> (i32, i32) {
    %c0_i32 = arith.constant 0 : i32
    %c0_i32_0 = arith.constant 0 : i32
    %c0_i32_1 = arith.constant 0 : i32
    return %c0_i32, %c0_i32_0 : i32, i32
  }
  func.func @transform_6(%arg0: i32) -> (i32, i32) {
    %c0_i32 = arith.constant 0 : i32
    %c0_i32_0 = arith.constant 0 : i32
    %c0_i32_1 = arith.constant 0 : i32
    return %c0_i32, %c0_i32_0 : i32, i32
  }
  func.func @transform_7(%arg0: i32) -> (i32, i32) {
    %c0_i32 = arith.constant 0 : i32
    %c0_i32_0 = arith.constant 0 : i32
    %c0_i32_1 = arith.constant 0 : i32
    return %c0_i32, %c0_i32_0 : i32, i32
  }
  func.func @transform_8(%arg0: i32) -> (i32, i32) {
    %c0_i32 = arith.constant 0 : i32
    %c0_i32_0 = arith.constant 0 : i32
    %c0_i32_1 = arith.constant 0 : i32
    return %c0_i32, %c0_i32_0 : i32, i32
  }
  func.func @transform_9(%arg0: i32) -> (i32, i32) {
    %c0_i32 = arith.constant 0 : i32
    %c0_i32_0 = arith.constant 0 : i32
    return %c0_i32, %arg0 : i32, i32
  }
}

</mosaic_0001>

<bundles_post_ra>
// kernel: implicit_network_forward.1
= control target key start
LH: loop header
LB: loop body
LE: loop exit
PB: predicated region body
PF: predicated region fallthrough
CT: control target
= control target key end

     0   :  { %s2416_s30 = smov 0   ;;  %s3655_s0 = inlined_call_operand.vmem [shape: f32[3,1024], index: 0, kind: input, shape index: {}]   ;;  %s3656_s1 = inlined_call_operand.vmem [shape: f32[64,3], index: 1, kind: input, shape index: {}]   ;;  %s3657_s2 = inlined_call_operand.vmem [shape: f32[32,1], index: 2, kind: input, shape index: {}]   ;;  %s3658_s3 = inlined_call_operand.vmem [shape: f32[29,32], index: 3, kind: input, shape index: {}]   ;;  %s3659_s4 = inlined_call_operand.vmem [shape: f32[29,1], index: 4, kind: input, shape index: {}]   ;;  %s3660_s5 = inlined_call_operand.vmem [shape: f32[32,29], index: 5, kind: input, shape index: {}]   ;;  %s3661_s6 = inlined_call_operand.vmem [shape: f32[32,1], index: 6, kind: input, shape index: {}]   ;;  %s3662_s7 = inlined_call_operand.vmem [shape: f32[5,32], index: 7, kind: input, shape index: {}]   ;;  %s3663_s8 = inlined_call_operand.vmem [shape: f32[5,1], index: 8, kind: input, shape index: {}]   ;;  %s3664_s9 = inlined_call_operand.vmem [shape: f32[5,1024], index: 9, kind: output, shape index: {}]  }
   0x1 LB: > { %s2097_s10 = sadd.s32 4294967295, %s2362_s30   ;;  %p2101_p0 = scmp.ge.s32.totalorder %s2362_s30, 1  ;;  %s2362_s30 = sphi %s2416_s30, %s19_s30  }
   0x2   : > { %p288_p1 = scmp.lt.s32.totalorder %s2362_s30, 3 }
   0x4   : > { %p289_p2 = pnand %p2101_p0, %p288_p1 }
   0x6   : > { %292 = sbr.rel (%p289_p2) target bundleno = 1059 (0x423), region = 56 }
   0xb   : > { %s2102_s11 = sshll.u32 %s2097_s10, 2  ;;  %v3665_v0 = vmov 0.0   ;;  %v613_v1 = vld [vmem:[%s3657_s2 + $0x18] sm:$0xff]  ;;  %v2365_v2 = vmov 0   ;;  %v611_v3 = vld [vmem:[%s3657_s2 + $0x8] sm:$0xff]  ;;  %v612_v4 = vld [vmem:[%s3657_s2 + $0x10] sm:$0xff] }
   0xc   : > { %p325_p3 = scmp.lt.s32.totalorder %s2102_s11, 7  ;;  %448 = vmatprep.mubr.f32.mxu0 %v3665_v0  ;;  %561 = vmatprep.mubr.f32.mxu1 %v3665_v0  ;;  %v610_v5 = vld [vmem:[%s3657_s2] sm:$0xff]  ;;  %vm375_vm0 = vcmask 1042432   ;;  %vm350_vm1 = vcmask 23552   ;;  %v913_v11 = vld [vmem:[%s3659_s4 + $0x18] sm:$0x1f] }
   0xd   : > { %2160 = vset.pattern.permute.xlu0 %v2365_v2  ;;  %2161 = vset.pattern.permute.xlu1 %v2365_v2  ;;  %v338_v10 = vld [vmem:[%s3656_s1] sm:$0xff]  ;;  %v912_v12 = vld [vmem:[%s3659_s4 + $0x10] sm:$0xff]  ;;  %v339_v13 = vld [vmem:[%s3656_s1 + $0x8] sm:$0xff] }
   0xe   : > { %s3969_s11 = smov (!%p325_p3, %s2102_s11), 7  ;;  %631 = vperm.xlu0 %2160, %v613_v1   ;;  %621 = vperm.xlu1 %2161, %v611_v3   ;;  %v911_v14 = vld [vmem:[%s3659_s4 + $0x8] sm:$0xff]  ;;  %v910_v15 = vld [vmem:[%s3659_s4] sm:$0xff]  ;;  %v340_v16 = vld [vmem:[%s3656_s1 + $0x10] sm:$0xff] }
   0xf   : > { %s2103_s20 = sshll.u32 %s3969_s11, 2  ;;  %v1592_v17 = vld [vmem:[%s3661_s6 + $0x18] sm:$0xff]  ;;  %v1591_v18 = vld [vmem:[%s3661_s6 + $0x10] sm:$0xff]  ;;  %v1590_v20 = vld [vmem:[%s3661_s6 + $0x8] sm:$0xff]  ;;  %s2105_s19 = sshll.u32 %s3969_s11, 3 }
  0x10   : > { %s328_s23 = scalar_lea.vmem %s3655_s0, %s2103_s20  ;;  %v341_v19 = vld [vmem:[%s3656_s1 + $0x18] sm:$0xff]  ;;  %v1589_v21 = vld [vmem:[%s3661_s6] sm:$0xff]  ;;  %v343_v24 = vld [vmem:[%s3656_s1 + $0x28] sm:$0xff]  ;;  %s334_s22 = scalar_lea.vmem %s3664_s9, %s2105_s19 }
  0x11   : > { %v336_v6 = vld [vmem:[%s328_s23] sm:$0x77]  ;;  %v337_v7 = vld [vmem:[%s328_s23 + $0x8] sm:$0x77]  ;;  %v344_v25 = vld [vmem:[%s3656_s1 + $0x30] sm:$0xff] }
  0x12   : > { %626 = vperm.xlu0 %2160, %v612_v4   ;;  %616 = vperm.xlu1 %2161, %v610_v5   ;;  %v348_v8 = vcombine.high %v336_v6, %v336_v6  ;;  %v349_v9 = vcombine.high %v337_v7, %v337_v7  ;;  %v1886_v22 = vld [vmem:[%s3663_s8] sm:$0x1f]  ;;  %v345_v26 = vld [vmem:[%s3656_s1 + $0x38] sm:$0xff] }
  0x13   : > { %v342_v23 = vld [vmem:[%s3656_s1 + $0x20] sm:$0xff] }
  0x14   : > { %2106 = vmatprep.subr.msk.mxu0 %vm375_vm0, %v348_v8  ;;  %2116 = vmatprep.subr.msk.mxu1 %vm375_vm0, %v349_v9 }
  0x15   : > { %2107 = vmatpush1.msk.msra.mxu0 %vm375_vm0, %v336_v6  ;;  %2117 = vmatpush1.msk.msra.mxu1 %vm375_vm0, %v337_v7 }
  0x16   : > { %2108 = vmatmul.mubr.msk.f32.vlgmr.msra.gmra.mxu0 %vm350_vm1, %v338_v10  ;;  %2118 = vmatmul.mubr.msk.f32.vlgmr.msra.gmra.mxu1 %vm350_vm1, %v338_v10 }
  0x17   : > { %454 = vmatprep.mubr.f32.mxu0 %v3665_v0  ;;  %567 = vmatprep.mubr.f32.mxu1 %v3665_v0 }
  0x18   : > { %931 = vperm.xlu0 %2160, %v913_v11   ;;  %926 = vperm.xlu1 %2161, %v912_v12  }
  0x1a   : > { %2109 = vmatmul.mubr.msk.f32.gmra.mxu0 %vm350_vm1, %v339_v13  ;;  %2119 = vmatmul.mubr.msk.f32.gmra.mxu1 %vm350_vm1, %v339_v13 }
  0x1b   : > { %460 = vmatprep.mubr.f32.mxu0 %v3665_v0  ;;  %573 = vmatprep.mubr.f32.mxu1 %v3665_v0 }
  0x1c   : > { %921 = vperm.xlu0 %2160, %v911_v14   ;;  %916 = vperm.xlu1 %2161, %v910_v15  }
  0x1e   : > { %2110 = vmatmul.mubr.msk.f32.gmra.mxu0 %vm350_vm1, %v340_v16  ;;  %2120 = vmatmul.mubr.msk.f32.gmra.mxu1 %vm350_vm1, %v340_v16 }
  0x1f   : > { %466 = vmatprep.mubr.f32.mxu0 %v3665_v0  ;;  %579 = vmatprep.mubr.f32.mxu1 %v3665_v0 }
  0x20   : > { %1610 = vperm.xlu0 %2160, %v1592_v17   ;;  %1605 = vperm.xlu1 %2161, %v1591_v18  }
  0x22   : > { %2111 = vmatmul.mubr.msk.f32.gmra.mxu0 %vm350_vm1, %v341_v19  ;;  %2121 = vmatmul.mubr.msk.f32.gmra.mxu1 %vm350_vm1, %v341_v19 }
  0x23   : > { %472 = vmatprep.mubr.f32.mxu0 %v3665_v0  ;;  %585 = vmatprep.mubr.f32.mxu1 %v3665_v0 }
  0x24   : > { %1600 = vperm.xlu0 %2160, %v1590_v20   ;;  %1595 = vperm.xlu1 %2161, %v1589_v21  }
  0x26   : > { %2112 = vmatmul.mubr.msk.f32.gmra.mxu0 %vm350_vm1, %v342_v23  ;;  %2122 = vmatmul.mubr.msk.f32.gmra.mxu1 %vm350_vm1, %v342_v23 }
  0x27   : > { %478 = vmatprep.mubr.f32.mxu0 %v3665_v0  ;;  %591 = vmatprep.mubr.f32.mxu1 %v3665_v0 }
  0x28   : > { %1889 = vperm.xlu0 %2160, %v1886_v22  }
  0x2a   : > { %2113 = vmatmul.mubr.msk.f32.gmra.mxu0 %vm350_vm1, %v343_v24  ;;  %2123 = vmatmul.mubr.msk.f32.gmra.mxu1 %vm350_vm1, %v343_v24 }
  0x2b   : > { %484 = vmatprep.mubr.f32.mxu0 %v3665_v0  ;;  %597 = vmatprep.mubr.f32.mxu1 %v3665_v0 }
  0x2e   : > { %2114 = vmatmul.mubr.msk.f32.gmra.mxu0 %vm350_vm1, %v344_v25  ;;  %2124 = vmatmul.mubr.msk.f32.gmra.mxu1 %vm350_vm1, %v344_v25 }
  0x2f   : > { %490 = vmatprep.mubr.f32.mxu0 %v3665_v0  ;;  %603 = vmatprep.mubr.f32.mxu1 %v3665_v0 }
  0x32   : > { %2115 = vmatmul.mubr.msk.f32.gmra.mxu0 %vm350_vm1, %v345_v26  ;;  %2125 = vmatmul.mubr.msk.f32.gmra.mxu1 %vm350_vm1, %v345_v26 }
  0x33   : > { %1011 = vmatprep.mubr.f32.mxu0 %v3665_v0  ;;  %1100 = vmatprep.mubr.f32.mxu1 %v3665_v0 }
  0x89   : > { %v622_v27 = vpop.permute.xlu1 %621  ;;  %v2527_v30 = vpop.permute.xlu0 %631 }
  0x8d   : > { %v617_v31 = vpop.permute.xlu1 %616  ;;  %v627_v43 = vpop.permute.xlu0 %626 }
  0xd6   : > { %v450_v28 = vpop.f32.mrf.mxu0  ;;  %v563_v29 = vpop.f32.mrf.mxu1 }
  0xd7   : > { %v2531_v37 = vadd.f32 %v617_v31, %v450_v28  ;;  %v2544_v46 = vadd.f32 %v617_v31, %v563_v29 }
  0xd8   : > { %v452_v32 = vpop.f32.mrf.mxu0  ;;  %v565_v33 = vpop.f32.mrf.mxu1 }
  0xd9   : > { %v2529_v34 = vadd.f32 %v617_v31, %v452_v32  ;;  %3728 = vst [vmem:[#allocation3_spill] sm:$0xff] %v2531_v37  ;;  %3734 = vst [vmem:[#allocation9_spill] sm:$0xff] %v2544_v46  ;;  %v2554_v52 = vmul.f32 100.0, %v2531_v37  ;;  %v2568_v62 = vmul.f32 100.0, %v2544_v46  ;;  %v2575_v6 = vadd.f32 %v617_v31, %v565_v33 }
  0xda   : > { %v456_v35 = vpop.f32.mrf.mxu0  ;;  %v569_v36 = vpop.f32.mrf.mxu1 }
  0xdb   : > { %3727 = vst [vmem:[#allocation2_spill] sm:$0xff] %v2529_v34  ;;  %v2534_v38 = vmul.f32 100.0, %v2529_v34  ;;  %v2536_v39 = vadd.f32 %v622_v27, %v456_v35  ;;  %v2538_v40 = vadd.f32 %v622_v27, %v569_v36  ;;  %3736 = vst [vmem:[#allocation11_spill] sm:$0xff] %v2554_v52  ;;  %v666_v5 = vmin.f32 %v2554_v52, 20.0 }
  0xdc   : > { %v458_v41 = vpop.f32.mrf.mxu0  ;;  %v571_v42 = vpop.f32.mrf.mxu1  ;;  %3738 = vst [vmem:[#allocation13_spill] sm:$0xff] %v2568_v62  ;;  %3739 = vst [vmem:[#allocation14_spill] sm:$0xff] %v2575_v6  ;;  %v2594_v20 = vmul.f32 100.0, %v2575_v6  ;;  %v668_v35 = vmin.f32 %v2568_v62, 20.0 }
  0xdd   : > { %3729 = vst [vmem:[#allocation4_spill] sm:$0xff] %v2534_v38  ;;  %3730 = vst [vmem:[#allocation5_spill] sm:$0xff] %v2536_v39  ;;  %v2540_v44 = vadd.f32 %v622_v27, %v458_v41  ;;  %v2542_v45 = vadd.f32 %v622_v27, %v571_v42  ;;  %v667_v47 = vmin.f32 %v2534_v38, 20.0  ;;  %v2548_v48 = vmul.f32 100.0, %v2536_v39 }
  0xde   : > { %3731 = vst [vmem:[#allocation6_spill] sm:$0xff] %v2538_v40  ;;  %v2551_v49 = vmul.f32 100.0, %v2538_v40  ;;  %v462_v50 = vpop.f32.mrf.mxu0  ;;  %v575_v51 = vpop.f32.mrf.mxu1  ;;  %3744 = vst [vmem:[#allocation19_spill] sm:$0xff] %v2594_v20 }
  0xdf   : > { %3732 = vst [vmem:[#allocation7_spill] sm:$0xff] %v2540_v44  ;;  %3733 = vst [vmem:[#allocation8_spill] sm:$0xff] %v2542_v45  ;;  %v2557_v53 = vmul.f32 100.0, %v2540_v44  ;;  %v2560_v54 = vmul.f32 100.0, %v2542_v45  ;;  %v2562_v55 = vadd.f32 %v627_v43, %v462_v50  ;;  %v700_v56 = vmul.f32 1.442695, %v667_v47 }
  0xe0   : > { %3735 = vst [vmem:[#allocation10_spill] sm:$0xff] %v2551_v49  ;;  %v670_v57 = vmin.f32 %v2548_v48, 20.0  ;;  %v464_v58 = vpop.f32.mrf.mxu0  ;;  %v577_v59 = vpop.f32.mrf.mxu1  ;;  %v672_v60 = vmin.f32 %v2551_v49, 20.0  ;;  %v2577_v8 = vadd.f32 %v627_v43, %v575_v51 }
  0xe1   : > { %3737 = vst [vmem:[#allocation12_spill] sm:$0xff] %v2562_v55  ;;  %v671_v61 = vmin.f32 %v2557_v53, 20.0  ;;  %v673_v1 = vmin.f32 %v2560_v54, 20.0  ;;  %v2572_v2 = vmul.f32 100.0, %v2562_v55  ;;  %2164 = vpow2.f32 %v700_v56 }
  0xe2   : > { %v706_v63 = vmul.f32 1.442695, %v670_v57  ;;  %v468_v3 = vpop.f32.mrf.mxu0  ;;  %v581_v4 = vpop.f32.mrf.mxu1  ;;  %3740 = vst [vmem:[#allocation15_spill] sm:$0xff] %v2577_v8  ;;  %v710_v9 = vmul.f32 1.442695, %v672_v60  ;;  %v2581_v12 = vmul.f32 100.0, %v2577_v8  ;;  %v2583_v13 = vadd.f32 %v627_v43, %v464_v58 }
  0xe3   : > { %v708_v7 = vmul.f32 1.442695, %v671_v61  ;;  %v712_v10 = vmul.f32 1.442695, %v673_v1  ;;  %v674_v11 = vmin.f32 %v2572_v2, 20.0  ;;  %v2585_v14 = vadd.f32 %v627_v43, %v577_v59 }
  0xe4   : > { %2166 = vpow2.f32 %v706_v63  ;;  %3741 = vst [vmem:[#allocation16_spill] sm:$0xff] %v2583_v13  ;;  %v2588_v16 = vadd.f32 %v2527_v30, %v468_v3  ;;  %v2591_v17 = vadd.f32 %v2527_v30, %v581_v4  ;;  %v470_v18 = vpop.f32.mrf.mxu0  ;;  %v583_v19 = vpop.f32.mrf.mxu1  ;;  %v676_v21 = vmin.f32 %v2581_v12, 20.0 }
  0xe5   : > { %3742 = vst [vmem:[#allocation17_spill] sm:$0xff] %v2585_v14  ;;  %2168 = vpow2.f32 %v708_v7  ;;  %v714_v15 = vmul.f32 1.442695, %v674_v11  ;;  %v2598_v22 = vmul.f32 100.0, %v2583_v13  ;;  %v2601_v23 = vmul.f32 100.0, %v2585_v14 }
  0xe6   : > { %3743 = vst [vmem:[#allocation18_spill] sm:$0xff] %v2591_v17  ;;  %2170 = vpow2.f32 %v712_v10  ;;  %v2604_v24 = vmul.f32 100.0, %v2588_v16  ;;  %v2607_v25 = vmul.f32 100.0, %v2591_v17  ;;  %v718_v26 = vmul.f32 1.442695, %v676_v21 }
  0xe7   : > { %2172 = vpow2.f32 %v714_v15  ;;  %v675_v27 = vmin.f32 %v2598_v22, 20.0  ;;  %v2611_v28 = vadd.f32 %v2527_v30, %v470_v18  ;;  %v2614_v29 = vadd.f32 %v2527_v30, %v583_v19 }
  0xe8   : > { %2174 = vpow2.f32 %v710_v9  ;;  %v677_v31 = vmin.f32 %v2601_v23, 20.0  ;;  %v678_v32 = vmin.f32 %v2604_v24, 20.0  ;;  %v680_v33 = vmin.f32 %v2607_v25, 20.0 }
  0xe9   : > { %3745 = vst [vmem:[#allocation20_spill] sm:$0xff] %v2614_v29  ;;  %2176 = vpow2.f32 %v718_v26  ;;  %v716_v36 = vmul.f32 1.442695, %v675_v27  ;;  %v2621_v41 = vmul.f32 100.0, %v2611_v28  ;;  %v669_v30 = vmin.f32 %v2594_v20, 20.0 }
  0xea   : > { %v720_v42 = vmul.f32 1.442695, %v677_v31  ;;  %v722_v43 = vmul.f32 1.442695, %v678_v32  ;;  %v726_v47 = vmul.f32 1.442695, %v680_v33 }
  0xeb   : > { %2178 = vpow2.f32 %v716_v36  ;;  %v679_v50 = vmin.f32 %v2621_v41, 20.0  ;;  %v2626_v51 = vmul.f32 100.0, %v2614_v29  ;;  %v698_v56 = vmul.f32 1.442695, %v666_v5 }
  0xec   : > { %2180 = vpow2.f32 %v720_v42  ;;  %v702_v59 = vmul.f32 1.442695, %v668_v35  ;;  %v704_v61 = vmul.f32 1.442695, %v669_v30  ;;  %vm695_vm11 = vcmp.gt.f32.partialorder %v2621_v41, 20.0 }
  0xed   : > { %2182 = vpow2.f32 %v722_v43  ;;  %v724_v57 = vmul.f32 1.442695, %v679_v50  ;;  %v681_v58 = vmin.f32 %v2626_v51, 20.0  ;;  %vm694_vm14 = vcmp.gt.f32.partialorder %v2604_v24, 20.0 }
  0xee   : > { %2184 = vpow2.f32 %v726_v47  ;;  %v2629_v60 = vpop.eup %2164  ;;  %vm697_vm0 = vcmp.gt.f32.partialorder %v2626_v51, 20.0  ;;  %vm691_vm1 = vcmp.gt.f32.partialorder %v2598_v22, 20.0  ;;  %vm692_vm15 = vcmp.gt.f32.partialorder %v2581_v12, 20.0  ;;  %v3782_v22 = vld [vmem:[#allocation17_spill] sm:$0xff] }
  0xef   : > { %2186 = vpow2.f32 %v724_v57  ;;  %v728_v63 = vmul.f32 1.442695, %v681_v58  ;;  %v739_v18 = vadd.f32 1.0, %v2629_v60  ;;  %v2646_v21 = vmul.f32 -0.5, %v2629_v60 }
  0xf0   : > { %2188 = vpow2.f32 %v698_v56 }
  0xf1   : > { %v2631_v1 = vpop.eup %2166  ;;  %2190 = vpow2.f32 %v728_v63 }
  0xf2   : > { %v2633_v3 = vpop.eup %2168  ;;  %2192 = vpow2.f32 %v702_v59  ;;  %v766_v10 = vadd.f32 1.0, %v2631_v1  ;;  %v769_v27 = vmul.f32 -0.5, %v2631_v1  ;;  %v772_v42 = vand.u32 2147483647, %v2631_v1 }
  0xf3   : > { %v2635_v4 = vpop.eup %2170  ;;  %v775_v5 = vadd.f32 1.0, %v2633_v3  ;;  %2194 = vpow2.f32 %v704_v61  ;;  %v778_v35 = vmul.f32 -0.5, %v2633_v3  ;;  %v781_v58 = vand.u32 2147483647, %v2633_v3 }
  0xf4   : > { %v2173_v7 = vpop.eup %2172  ;;  %v793_v9 = vadd.f32 1.0, %v2635_v4  ;;  %v796_v36 = vmul.f32 -0.5, %v2635_v4  ;;  %vm2708_vm5 = vcmp.lt.f32.partialorder %v772_v42, 0.0004427343 }
  0xf5   : > { %v802_v11 = vadd.f32 1.0, %v2173_v7  ;;  %2196 = vlog2.f32 %v775_v5  ;;  %v2640_v15 = vpop.eup %2174  ;;  %v805_v33 = vmul.f32 -0.5, %v2173_v7  ;;  %v808_v57 = vand.u32 2147483647, %v2173_v7 }
  0xf6   : > { %2198 = vlog2.f32 %v793_v9  ;;  %v2643_v19 = vpop.eup %2176  ;;  %v2660_v30 = vadd.f32 1.0, %v2640_v15  ;;  %v2663_v50 = vmul.f32 -0.5, %v2640_v15  ;;  %v799_v5 = vand.u32 2147483647, %v2635_v4 }
  0xf7   : > { %2200 = vlog2.f32 %v802_v11  ;;  %v820_v26 = vadd.f32 1.0, %v2643_v19  ;;  %v770_v9 = vadd.f32 1.0, %v769_v27  ;;  %v779_v0 = vadd.f32 1.0, %v778_v35 }
  0xf8   : > { %2202 = vlog2.f32 %v766_v10  ;;  %v2651_v32 = vpop.eup %2178  ;;  %v797_v31 = vadd.f32 1.0, %v796_v36  ;;  %v823_v62 = vmul.f32 -0.5, %v2643_v19  ;;  %vm2682_vm2 = vcmp.lt.f32.partialorder %v808_v57, 0.0004427343 }
  0xf9   : > { %v2656_v43 = vpop.eup %2180  ;;  %v811_v47 = vadd.f32 1.0, %v2651_v32  ;;  %2204 = vlog2.f32 %v739_v18  ;;  %v806_v18 = vadd.f32 1.0, %v805_v33  ;;  %v826_v6 = vand.u32 2147483647, %v2643_v19 }
  0xfa   : > { %v2665_v56 = vpop.eup %2182  ;;  %2206 = vlog2.f32 %v820_v26  ;;  %v829_v52 = vadd.f32 1.0, %v2656_v43  ;;  %vm2691_vm3 = vcmp.lt.f32.partialorder %v781_v58, 0.0004427343  ;;  %v817_v57 = vand.u32 2147483647, %v2651_v32 }
  0xfb   : > { %v2669_v61 = vpop.eup %2184  ;;  %v838_v63 = vadd.f32 1.0, %v2665_v56  ;;  %2208 = vlog2.f32 %v811_v47  ;;  %v841_v59 = vmul.f32 -0.5, %v2665_v56  ;;  %v807_v40 = vmul.f32 %v2173_v7, %v806_v18 }
  0xfc   : > { %v2187_v10 = vpop.eup %2186  ;;  %v856_v11 = vadd.f32 1.0, %v2669_v61  ;;  %v859_v27 = vmul.f32 -0.5, %v2669_v61  ;;  %v780_v34 = vmul.f32 %v2633_v3, %v779_v0  ;;  %v2700_v45 = vmul.f32 %v2635_v4, %v797_v31 }
  0xfd   : > { %v2674_v46 = vpop.eup %2188  ;;  %v847_v26 = vadd.f32 1.0, %v2187_v10  ;;  %2210 = vlog2.f32 %v838_v63  ;;  %v850_v47 = vmul.f32 -0.5, %v2187_v10  ;;  %v814_v63 = vmul.f32 -0.5, %v2651_v32 }
  0xfe   : > { %v2678_v37 = vpop.eup %2190  ;;  %2212 = vlog2.f32 %v856_v11  ;;  %vm2702_vm4 = vcmp.lt.f32.partialorder %v799_v5, 0.0004427343  ;;  %v853_v38 = vand.u32 2147483647, %v2187_v10  ;;  %v842_v58 = vadd.f32 1.0, %v841_v59 }
  0xff   : > { %v2686_v35 = vpop.eup %2192  ;;  %2214 = vlog2.f32 %v847_v26  ;;  %v865_v36 = vadd.f32 1.0, %v2678_v37  ;;  %v844_v39 = vand.u32 2147483647, %v2665_v56  ;;  %v851_v44 = vadd.f32 1.0, %v850_v47 }
 0x100   : > { %3748 = vst [vmem:[#allocation21_spill] sm:$0xff] %v2686_v35  ;;  %v2695_v11 = vpop.eup %2194  ;;  %v868_v14 = vmul.f32 -0.5, %v2678_v37  ;;  %v860_v7 = vadd.f32 1.0, %v859_v27  ;;  %v862_v4 = vand.u32 2147483647, %v2669_v61  ;;  %v815_v31 = vadd.f32 1.0, %v814_v63 }
 0x101   : > { %2216 = vlog2.f32 %v865_v36  ;;  %v832_v5 = vmul.f32 -0.5, %v2656_v43  ;;  %v835_v59 = vand.u32 2147483647, %v2656_v43  ;;  %v871_v36 = vand.u32 2147483647, %v2678_v37 }
 0x102   : > { %v2197_v49 = vpop.eup %2196  ;;  %2218 = vlog2.f32 %v829_v52  ;;  %v771_v27 = vmul.f32 %v2631_v1, %v770_v9  ;;  %vm2717_vm6 = vcmp.lt.f32.partialorder %v844_v39, 0.0004427343  ;;  %v824_v42 = vadd.f32 1.0, %v823_v62  ;;  %v3777_v9 = vld [vmem:[#allocation12_spill] sm:$0xff] }
 0x103   : > { %v2199_v8 = vpop.eup %2198  ;;  %v777_v35 = vmul.f32 0.6931472, %v2197_v49  ;;  %2220 = vlog2.f32 %v2660_v30  ;;  %v852_v55 = vmul.f32 %v2187_v10, %v851_v44  ;;  %vm2722_vm7 = vcmp.lt.f32.partialorder %v853_v38, 0.0004427343 }
 0x104   : > { %v2201_v3 = vpop.eup %2200  ;;  %v795_v17 = vmul.f32 0.6931472, %v2199_v8  ;;  %v869_v29 = vadd.f32 1.0, %v868_v14  ;;  %v2728_v49 = vmul.f32 %v2669_v61, %v860_v7  ;;  %vm2730_vm8 = vcmp.lt.f32.partialorder %v862_v4, 0.0004427343 }
 0x105   : > { %v2203_v18 = vpop.eup %2202  ;;  %v804_v47 = vmul.f32 0.6931472, %v2201_v3  ;;  %v843_v3 = vmul.f32 %v2665_v56, %v842_v58  ;;  %v816_v62 = vmul.f32 %v2651_v32, %v815_v31  ;;  %vm2737_vm9 = vcmp.lt.f32.partialorder %v871_v36, 0.0004427343  ;;  %v3787_v31 = vld [vmem:[#allocation10_spill] sm:$0xff] }
 0x106   : > { %v2205_v63 = vpop.eup %2204  ;;  %v768_v38 = vmul.f32 0.6931472, %v2203_v18  ;;  %vm2741_vm10 = vcmp.lt.f32.partialorder %v817_v57, 0.0004427343  ;;  %v833_v56 = vadd.f32 1.0, %v832_v5  ;;  %v783_v61 = vsel %vm2691_vm3, %v780_v34, %v777_v35 }
 0x107   : > { %v2207_v39 = vpop.eup %2206  ;;  %v810_v44 = vsel %vm2682_vm2, %v807_v40, %v804_v47  ;;  %vm2748_vm12 = vcmp.lt.f32.partialorder %v835_v59, 0.0004427343  ;;  %v825_v40 = vmul.f32 %v2643_v19, %v824_v42  ;;  %vm2753_vm13 = vcmp.lt.f32.partialorder %v826_v6, 0.0004427343 }
 0x108   : > { %v2209_v8 = vpop.eup %2208  ;;  %v801_v33 = vsel %vm2702_vm4, %v2700_v45, %v795_v17  ;;  %v870_v34 = vmul.f32 %v2678_v37, %v869_v29  ;;  %v882_v20 = vmul.f32 0.01, %v810_v44  ;;  %v822_v35 = vmul.f32 0.6931472, %v2207_v39 }
 0x109   : > { %v813_v32 = vmul.f32 0.6931472, %v2209_v8  ;;  %v788_v58 = vadd.f32 1.0, %v2663_v50  ;;  %v879_v19 = vmul.f32 0.01, %v783_v61  ;;  %v774_v45 = vsel %vm2708_vm5, %v771_v27, %v768_v38 }
 0x10a   : > { %v2211_v57 = vpop.eup %2210  ;;  %v743_v17 = vadd.f32 1.0, %v2646_v21  ;;  %v834_v29 = vmul.f32 %v2656_v43, %v833_v56  ;;  %v2771_v50 = vmul.f32 0.01, %v801_v33  ;;  %v3769_v4 = vand.u32 2147483647, %v2640_v15 }
 0x10b   : > { %v2213_v7 = vpop.eup %2212  ;;  %v840_v6 = vmul.f32 0.6931472, %v2211_v57  ;;  %v741_v5 = vmul.f32 0.6931472, %v2205_v63  ;;  %v819_v21 = vsel %vm2741_vm10, %v816_v62, %v813_v32  ;;  %vm693_vm4 = vcmp.gt.f32.partialorder %v2601_v23, 20.0  ;;  %v3775_v57 = vld [vmem:[#allocation20_spill] sm:$0xff] }
 0x10c   : > { %v2215_v26 = vpop.eup %2214  ;;  %v858_v37 = vmul.f32 0.6931472, %v2213_v7  ;;  %vm2775_vm3 = vcmp.lt.f32.partialorder %v3769_v4, 0.0004427343  ;;  %vm687_vm5 = vcmp.gt.f32.partialorder %v2557_v53, 20.0  ;;  %v757_v43 = vadd.f32 1.0, %v2695_v11 }
 0x10d   : > { %v849_v59 = vmul.f32 0.6931472, %v2215_v26  ;;  %v846_v0 = vsel %vm2717_vm6, %v843_v3, %v840_v6  ;;  %vm686_vm2 = vcmp.gt.f32.partialorder %v2548_v48, 20.0  ;;  %v828_v47 = vsel %vm2753_vm13, %v825_v40, %v822_v35  ;;  %v3781_v7 = vld [vmem:[#allocation21_spill] sm:$0xff]  ;;  %v3784_v26 = vld [vmem:[#allocation15_spill] sm:$0xff]  ;;  %v3786_v23 = vld [vmem:[#allocation4_spill] sm:$0xff] }
 0x10e   : > { %v2217_v18 = vpop.eup %2216  ;;  %v864_v36 = vsel %vm2730_vm8, %v2728_v49, %v858_v37  ;;  %v878_v27 = vmul.f32 0.01, %v774_v45  ;;  %v3772_v52 = vand.u32 2147483647, %v2629_v60  ;;  %v886_v62 = vmul.f32 0.01, %v846_v0 }
 0x10f   : > { %v2219_v63 = vpop.eup %2218  ;;  %v855_v3 = vsel %vm2722_vm7, %v852_v55, %v849_v59  ;;  %v867_v39 = vmul.f32 0.6931472, %v2217_v18  ;;  %vm689_vm10 = vcmp.gt.f32.partialorder %v2560_v54, 20.0  ;;  %v744_v49 = vmul.f32 %v2629_v60, %v743_v17  ;;  %v3788_v53 = vld [vmem:[#allocation8_spill] sm:$0xff]  ;;  %v3790_v59 = vld [vmem:[#allocation6_spill] sm:$0xff] }
 0x110   : > { %vm2795_vm6 = vcmp.lt.f32.partialorder %v3772_v52, 0.0004427343  ;;  %v887_v1 = vmul.f32 0.01, %v855_v3  ;;  %v883_v44 = vmul.f32 0.01, %v819_v21  ;;  %2222 = vlog2.f32 %v757_v43  ;;  %v2221_v55 = vpop.eup %2220 }
 0x111   : > { %v831_v38 = vmul.f32 0.6931472, %v2219_v63  ;;  %v873_v8 = vsel %vm2737_vm9, %v870_v34, %v867_v39  ;;  %v888_v14 = vmul.f32 0.01, %v864_v36  ;;  %v789_v56 = vmul.f32 %v2640_v15, %v788_v58  ;;  %v3791_v39 = vld [vmem:[#allocation19_spill] sm:$0xff] }
 0x112   : > { %v747_v13 = vsel %vm2795_vm6, %v744_v49, %v741_v5  ;;  %v903_v61 = vsel %vm695_vm11, %v2611_v28, %v887_v1  ;;  %v889_v32 = vmul.f32 0.01, %v873_v8  ;;  %v884_v40 = vmul.f32 0.01, %v828_v47  ;;  %v3776_v28 = vld [vmem:[#allocation16_spill] sm:$0xff]  ;;  %v3789_v5 = vld [vmem:[#allocation2_spill] sm:$0xff] }
 0x113   : > { %v837_v60 = vsel %vm2748_vm12, %v834_v29, %v831_v38  ;;  %971 = vmatprep.subr.mxu0 %v903_v61  ;;  %v902_v30 = vsel %vm694_vm14, %v2588_v16, %v886_v62  ;;  %v786_v15 = vmul.f32 0.6931472, %v2221_v55  ;;  %v730_v33 = vadd.f32 1.0, %v2674_v46  ;;  %v3779_v16 = vld [vmem:[#allocation18_spill] sm:$0xff]  ;;  %v3785_v29 = vld [vmem:[#allocation5_spill] sm:$0xff]  ;;  %v3793_v55 = vld [vmem:[#allocation11_spill] sm:$0xff] }
 0x114   : > { %v885_v10 = vmul.f32 0.01, %v837_v60  ;;  %v905_v34 = vsel %vm697_vm0, %v3775_v57, %v889_v32  ;;  %972 = vmatpush1.msra.mxu0 %v902_v30  ;;  %v899_v41 = vsel %vm691_vm1, %v3776_v28, %v883_v44  ;;  %vm3778_vm7 = vcmp.gt.f32.partialorder %v2572_v2, 20.0  ;;  %v3783_v2 = vld [vmem:[#allocation7_spill] sm:$0xff]  ;;  %v3792_v49 = vld [vmem:[#allocation14_spill] sm:$0xff]  ;;  %v3795_v30 = vld [vmem:[#allocation13_spill] sm:$0xff] }
 0x115   : > { %v898_v35 = vsel %vm3778_vm7, %v3777_v9, %v882_v20  ;;  %v875_v58 = vmul.f32 0.01, %v747_v13  ;;  %1060 = vmatprep.subr.mxu1 %v905_v34  ;;  %vm3780_vm8 = vcmp.gt.f32.partialorder %v2607_v25, 20.0  ;;  %973 = vmatprep.subr.mxu0 %v899_v41  ;;  %v792_v51 = vsel %vm2775_vm3, %v789_v56, %v786_v15  ;;  %v906_v32 = vld [vmem:[%s3658_s3] sm:$0xff]  ;;  %v3794_v60 = vld [vmem:[#allocation3_spill] sm:$0xff]  ;;  %v908_v34 = vld [vmem:[%s3658_s3 + $0x10] sm:$0xff]  ;;  %v2895_v41 = vpop.f32.mrf.mxu0  ;;  %v2897_v9 = vpop.f32.mrf.mxu1 }
 0x116   : > { %v904_v24 = vsel %vm3780_vm8, %v3779_v16, %v888_v14  ;;  %2224 = vlog2.f32 %v730_v33  ;;  %v748_v6 = vadd.f32 1.0, %v3781_v7  ;;  %v901_v45 = vsel %vm693_vm4, %v3782_v22, %v885_v10  ;;  %974 = vmatpush1.msra.mxu0 %v898_v35  ;;  %v3796_v10 = vld [vmem:[#allocation9_spill] sm:$0xff]  ;;  %v907_v57 = vld [vmem:[%s3658_s3 + $0x8] sm:$0xff]  ;;  %3798 = vst [vmem:[#allocation20_spill] sm:$0xff] %v2895_v41  ;;  %3799 = vst [vmem:[#allocation16_spill] sm:$0xff] %v2897_v9 }
 0x117   : > { %1061 = vmatpush1.msra.mxu1 %v904_v24  ;;  %v895_v20 = vsel %vm687_vm5, %v3783_v2, %v879_v19  ;;  %v880_v17 = vmul.f32 0.01, %v792_v51  ;;  %v760_v25 = vmul.f32 -0.5, %v2695_v11  ;;  %v900_v37 = vsel %vm692_vm15, %v3784_v26, %v884_v40  ;;  %v909_v28 = vld [vmem:[%s3658_s3 + $0x18] sm:$0x1f]  ;;  %v2899_v35 = vpop.f32.mrf.mxu0 }
 0x118   : > { %1062 = vmatprep.subr.mxu1 %v901_v45  ;;  %975 = vmatprep.subr.mxu0 %v895_v20  ;;  %v894_v4 = vsel %vm686_vm2, %v3785_v29, %v878_v27  ;;  %vm683_vm9 = vcmp.gt.f32.partialorder %v3786_v23, 20.0  ;;  %2226 = vlog2.f32 %v748_v6  ;;  %vm688_vm11 = vcmp.gt.f32.partialorder %v3787_v31, 20.0  ;;  %3800 = vst [vmem:[#allocation12_spill] sm:$0xff] %v2899_v35  ;;  %v2927_v29 = vpop.permute.xlu0 %931 }
 0x119   : > { %1063 = vmatpush1.msra.mxu1 %v900_v37  ;;  %v897_v19 = vsel %vm689_vm10, %v3788_v53, %v2771_v50  ;;  %976 = vmatpush1.msra.mxu0 %v894_v4  ;;  %v891_v12 = vsel %vm683_vm9, %v3789_v5, %v875_v58  ;;  %v896_v0 = vsel %vm688_vm11, %v3790_v59, %v880_v17  ;;  %v761_v48 = vadd.f32 1.0, %v760_v25  ;;  %v2901_v58 = vpop.f32.mrf.mxu1  ;;  %v2903_v16 = vpop.f32.mrf.mxu0 }
 0x11a   : > { %1064 = vmatprep.subr.mxu1 %v897_v19  ;;  %977 = vmatprep.subr.mxu0 %v891_v12  ;;  %v763_v21 = vand.u32 2147483647, %v2695_v11  ;;  %v733_v43 = vmul.f32 -0.5, %v2674_v46  ;;  %v751_v36 = vmul.f32 -0.5, %v3781_v7  ;;  %v736_v52 = vand.u32 2147483647, %v2674_v46  ;;  %v927_v25 = vpop.permute.xlu1 %926 }
 0x11b   : > { %1065 = vmatpush1.msra.mxu1 %v896_v0  ;;  %v762_v54 = vmul.f32 %v2695_v11, %v761_v48  ;;  %vm685_vm13 = vcmp.gt.f32.partialorder %v3791_v39, 20.0  ;;  %v754_v62 = vand.u32 2147483647, %v3781_v7  ;;  %vm682_vm0 = vcmp.gt.f32.partialorder %v3793_v55, 20.0  ;;  %3801 = vst [vmem:[#allocation18_spill] sm:$0xff] %v2901_v58  ;;  %3802 = vst [vmem:[#allocation21_spill] sm:$0xff] %v2903_v16  ;;  %v2905_v24 = vpop.f32.mrf.mxu1  ;;  %v2907_v51 = vpop.f32.mrf.mxu0 }
 0x11c   : > { %vm764_vm12 = vcmp.lt.f32.partialorder %v763_v21, 0.0004427343  ;;  %v734_v50 = vadd.f32 1.0, %v733_v43  ;;  %v752_v63 = vadd.f32 1.0, %v751_v36  ;;  %vm737_vm14 = vcmp.lt.f32.partialorder %v736_v52, 0.0004427343  ;;  %v922_v0 = vpop.permute.xlu0 %921 }
 0x11d   : > { %v2223_v18 = vpop.eup %2222  ;;  %vm755_vm15 = vcmp.lt.f32.partialorder %v754_v62, 0.0004427343  ;;  %vm3707_vm1 = vcmask 261120   ;;  %vm684_vm2 = vcmp.gt.f32.partialorder %v3795_v30, 20.0  ;;  %v3797_v33 = vmov 0.0   ;;  %3803 = vst [vmem:[#allocation17_spill] sm:$0xff] %v2905_v24  ;;  %v2911_v6 = vpop.f32.mrf.mxu0 }
 0x11e   : > { %v759_v47 = vmul.f32 0.6931472, %v2223_v18  ;;  %v735_v38 = vmul.f32 %v2674_v46, %v734_v50  ;;  %v753_v56 = vmul.f32 %v3781_v7, %v752_v63  ;;  %3804 = vst [vmem:[#allocation7_spill] sm:$0xff] %v2907_v51  ;;  %v2909_v7 = vpop.f32.mrf.mxu1  ;;  %3806 = vst [vmem:[#allocation5_spill] sm:$0xff] %v2911_v6  ;;  %v917_v23 = vpop.permute.xlu1 %916  ;;  %vm1398_vm11 = vcmask 1044480  }
 0x11f   : > { %3805 = vst [vmem:[#allocation15_spill] sm:$0xff] %v2909_v7  ;;  %v2915_v45 = vpop.f32.mrf.mxu0 }
 0x120   : > { %v765_v27 = vsel %vm764_vm12, %v762_v54, %v759_v47  ;;  %v2913_v22 = vpop.f32.mrf.mxu1  ;;  %3808 = vst [vmem:[#allocation10_spill] sm:$0xff] %v2915_v45 }
 0x121   : > { %v877_v42 = vmul.f32 0.01, %v765_v27  ;;  %3807 = vst [vmem:[#allocation4_spill] sm:$0xff] %v2913_v22  ;;  %v2919_v20 = vpop.f32.mrf.mxu0 }
 0x122   : > { %v2917_v2 = vpop.f32.mrf.mxu1  ;;  %3810 = vst [vmem:[#allocation2_spill] sm:$0xff] %v2919_v20 }
 0x123   : > { %v2225_v3 = vpop.eup %2224  ;;  %v893_v1 = vsel %vm685_vm13, %v3792_v49, %v877_v42  ;;  %3809 = vst [vmem:[#allocation8_spill] sm:$0xff] %v2917_v2  ;;  %v2923_v26 = vpop.f32.mrf.mxu0 }
 0x124   : > { %v732_v44 = vmul.f32 0.6931472, %v2225_v3  ;;  %1066 = vmatprep.subr.mxu1 %v893_v1  ;;  %v2921_v17 = vpop.f32.mrf.mxu1  ;;  %3812 = vst [vmem:[#allocation19_spill] sm:$0xff] %v2923_v26 }
 0x125   : > { %v2227_v8 = vpop.eup %2226  ;;  %3811 = vst [vmem:[#allocation6_spill] sm:$0xff] %v2921_v17 }
 0x126   : > { %v738_v11 = vsel %vm737_vm14, %v735_v38, %v732_v44  ;;  %v750_v14 = vmul.f32 0.6931472, %v2227_v8  ;;  %v2925_v37 = vpop.f32.mrf.mxu1 }
 0x127   : > { %v874_v13 = vmul.f32 0.01, %v738_v11  ;;  %3813 = vst [vmem:[#allocation14_spill] sm:$0xff] %v2925_v37 }
 0x128   : > { %v756_v61 = vsel %vm755_vm15, %v753_v56, %v750_v14 }
 0x129   : > { %v890_v40 = vsel %vm682_vm0, %v3794_v60, %v874_v13  ;;  %v876_v46 = vmul.f32 0.01, %v756_v61 }
 0x12a   : > { %978 = vmatpush1.msra.mxu0 %v890_v40 }
 0x12b   : > { %v892_v15 = vsel %vm684_vm2, %v3796_v10, %v876_v46  ;;  %2126 = vmatmul.mubr.msk.f32.vlgmr.msra.gmra.mxu0 %vm3707_vm1, %v906_v32 }
 0x12c   : > { %1067 = vmatpush1.msra.mxu1 %v892_v15  ;;  %1017 = vmatprep.mubr.f32.mxu0 %v3797_v33 }
 0x12d   : > { %2130 = vmatmul.mubr.msk.f32.vlgmr.msra.gmra.mxu1 %vm3707_vm1, %v906_v32 }
 0x12e   : > { %1106 = vmatprep.mubr.f32.mxu1 %v3797_v33 }
 0x12f   : > { %2127 = vmatmul.mubr.msk.f32.gmra.mxu0 %vm3707_vm1, %v907_v57 }
 0x130   : > { %1023 = vmatprep.mubr.f32.mxu0 %v3797_v33 }
 0x131   : > { %2131 = vmatmul.mubr.msk.f32.gmra.mxu1 %vm3707_vm1, %v907_v57 }
 0x132   : > { %1112 = vmatprep.mubr.f32.mxu1 %v3797_v33 }
 0x133   : > { %2128 = vmatmul.mubr.msk.f32.gmra.mxu0 %vm3707_vm1, %v908_v34 }
 0x134   : > { %1029 = vmatprep.mubr.f32.mxu0 %v3797_v33 }
 0x135   : > { %2132 = vmatmul.mubr.msk.f32.gmra.mxu1 %vm3707_vm1, %v908_v34 }
 0x136   : > { %1118 = vmatprep.mubr.f32.mxu1 %v3797_v33 }
 0x137   : > { %2129 = vmatmul.mubr.msk.f32.gmra.mxu0 %vm3707_vm1, %v909_v28 }
 0x138   : > { %1475 = vmatprep.mubr.f32.mxu0 %v3797_v33 }
 0x139   : > { %2133 = vmatmul.mubr.msk.f32.gmra.mxu1 %vm3707_vm1, %v909_v28 }
 0x13a   : > { %1564 = vmatprep.mubr.f32.mxu1 %v3797_v33 }
 0x1eb   : > { %v1013_v4 = vpop.f32.mrf.mxu0 }
 0x1ec   : > { %v2929_v31 = vadd.f32 %v1013_v4, %v917_v23 }
 0x1ed   : > { %v1102_v53 = vpop.f32.mrf.mxu1  ;;  %v1015_v19 = vpop.f32.mrf.mxu0 }
 0x1ee   : > { %3814 = vst [vmem:[#allocation11_spill] sm:$0xff] %v2929_v31  ;;  %v2931_v5 = vadd.f32 %v1015_v19, %v917_v23  ;;  %v2937_v21 = vmul.f32 100.0, %v2929_v31  ;;  %v2939_v43 = vadd.f32 %v1102_v53, %v917_v23 }
 0x1ef   : > { %v1104_v12 = vpop.f32.mrf.mxu1  ;;  %v1019_v59 = vpop.f32.mrf.mxu0 }
 0x1f0   : > { %3815 = vst [vmem:[#allocation3_spill] sm:$0xff] %v2931_v5  ;;  %v2934_v48 = vmul.f32 100.0, %v2931_v5  ;;  %3817 = vst [vmem:[#allocation9_spill] sm:$0xff] %v2937_v21  ;;  %v2941_v18 = vadd.f32 %v1019_v59, %v922_v0  ;;  %v1141_v39 = vmin.f32 %v2937_v21, 20.0  ;;  %v2955_v62 = vmul.f32 100.0, %v2939_v43 }
 0x1f1   : > { %3818 = vst [vmem:[#allocation22_spill] sm:$0xff] %v2939_v43  ;;  %v1108_v36 = vpop.f32.mrf.mxu1  ;;  %v1021_v47 = vpop.f32.mrf.mxu0  ;;  %v2970_v32 = vadd.f32 %v1104_v12, %v917_v23 }
 0x1f2   : > { %3816 = vst [vmem:[#allocation13_spill] sm:$0xff] %v2934_v48  ;;  %3819 = vst [vmem:[#allocation23_spill] sm:$0xff] %v2941_v18  ;;  %v1142_v54 = vmin.f32 %v2934_v48, 20.0  ;;  %v2945_v50 = vmul.f32 100.0, %v2941_v18  ;;  %v2947_v27 = vadd.f32 %v1108_v36, %v922_v0  ;;  %v2949_v52 = vadd.f32 %v1021_v47, %v922_v0 }
 0x1f3   : > { %v1110_v42 = vpop.f32.mrf.mxu1  ;;  %v1025_v63 = vpop.f32.mrf.mxu0  ;;  %3823 = vst [vmem:[#allocation27_spill] sm:$0xff] %v2955_v62  ;;  %3826 = vst [vmem:[#allocation30_spill] sm:$0xff] %v2970_v32  ;;  %v1173_v10 = vmul.f32 1.442695, %v1141_v39  ;;  %v1143_v15 = vmin.f32 %v2955_v62, 20.0 }
 0x1f4   : > { %3820 = vst [vmem:[#allocation24_spill] sm:$0xff] %v2947_v27  ;;  %3821 = vst [vmem:[#allocation25_spill] sm:$0xff] %v2949_v52  ;;  %v2951_v3 = vadd.f32 %v1110_v42, %v922_v0  ;;  %v1145_v49 = vmin.f32 %v2945_v50, 20.0  ;;  %v2959_v1 = vmul.f32 100.0, %v2947_v27  ;;  %v2962_v8 = vmul.f32 100.0, %v2949_v52 }
 0x1f5   : > { %v1114_v44 = vpop.f32.mrf.mxu1  ;;  %v1027_v38 = vpop.f32.mrf.mxu0  ;;  %v2967_v14 = vadd.f32 %v1025_v63, %v927_v25  ;;  %v1175_v56 = vmul.f32 1.442695, %v1142_v54  ;;  %v2995_v63 = vmul.f32 100.0, %v2970_v32  ;;  %vm1161_vm1 = vcmp.gt.f32.partialorder %v2945_v50, 20.0 }
 0x1f6   : > { %3822 = vst [vmem:[#allocation26_spill] sm:$0xff] %v2951_v3  ;;  %3824 = vst [vmem:[#allocation28_spill] sm:$0xff] %v2959_v1  ;;  %v2965_v11 = vmul.f32 100.0, %v2951_v3  ;;  %v1181_v13 = vmul.f32 1.442695, %v1145_v49  ;;  %v1147_v55 = vmin.f32 %v2959_v1, 20.0  ;;  %v2978_v57 = vadd.f32 %v1114_v44, %v927_v25 }
 0x1f7   : > { %3825 = vst [vmem:[#allocation29_spill] sm:$0xff] %v2967_v14  ;;  %v1116_v61 = vpop.f32.mrf.mxu1  ;;  %v1146_v60 = vmin.f32 %v2962_v8, 20.0  ;;  %v2975_v46 = vmul.f32 100.0, %v2967_v14  ;;  %v1031_v30 = vpop.f32.mrf.mxu0  ;;  %v2980_v34 = vadd.f32 %v1027_v38, %v927_v25  ;;  %3829 = vst [vmem:[#allocation33_spill] sm:$0xff] %v2995_v63 }
 0x1f8   : > { %v1148_v40 = vmin.f32 %v2965_v11, 20.0  ;;  %3827 = vst [vmem:[#allocation31_spill] sm:$0xff] %v2978_v57  ;;  %2228 = vpow2.f32 %v1181_v13  ;;  %v1185_v19 = vmul.f32 1.442695, %v1147_v55  ;;  %v2984_v12 = vmul.f32 100.0, %v2978_v57 }
 0x1f9   : > { %v1120_v28 = vpop.f32.mrf.mxu1  ;;  %v1183_v4 = vmul.f32 1.442695, %v1146_v60  ;;  %v1149_v53 = vmin.f32 %v2975_v46, 20.0  ;;  %2230 = vpow2.f32 %v1175_v56  ;;  %v2987_v59 = vmul.f32 100.0, %v2980_v34  ;;  %v1033_v54 = vpop.f32.mrf.mxu0 }
 0x1fa   : > { %v1187_v23 = vmul.f32 1.442695, %v1148_v40  ;;  %v2989_v36 = vadd.f32 %v1116_v61, %v927_v25  ;;  %v2992_v47 = vadd.f32 %v1031_v30, %v2927_v29  ;;  %v1151_v39 = vmin.f32 %v2984_v12, 20.0 }
 0x1fb   : > { %2232 = vpow2.f32 %v1183_v4  ;;  %v1189_v0 = vmul.f32 1.442695, %v1149_v53  ;;  %v1122_v42 = vpop.f32.mrf.mxu1  ;;  %v1150_v49 = vmin.f32 %v2987_v59, 20.0  ;;  %v3006_v38 = vadd.f32 %v1120_v28, %v2927_v29 }
 0x1fc   : > { %3828 = vst [vmem:[#allocation32_spill] sm:$0xff] %v2989_v36  ;;  %2234 = vpow2.f32 %v1187_v23  ;;  %v3000_v44 = vmul.f32 100.0, %v2989_v36  ;;  %v3003_v25 = vmul.f32 100.0, %v2992_v47  ;;  %v1193_v56 = vmul.f32 1.442695, %v1151_v39 }
 0x1fd   : > { %2236 = vpow2.f32 %v1189_v0  ;;  %3830 = vst [vmem:[#allocation34_spill] sm:$0xff] %v3006_v38  ;;  %v1191_v13 = vmul.f32 1.442695, %v1150_v49  ;;  %v3009_v55 = vadd.f32 %v1033_v54, %v2927_v29  ;;  %v3012_v61 = vadd.f32 %v1122_v42, %v2927_v29 }
 0x1fe   : > { %2238 = vpow2.f32 %v1185_v19  ;;  %v1152_v60 = vmin.f32 %v3000_v44, 20.0  ;;  %v1153_v40 = vmin.f32 %v3003_v25, 20.0  ;;  %v3017_v30 = vmul.f32 100.0, %v3006_v38 }
 0x1ff   : > { %v1144_v4 = vmin.f32 %v2995_v63, 20.0  ;;  %2240 = vpow2.f32 %v1193_v56  ;;  %v3021_v28 = vmul.f32 100.0, %v3009_v55  ;;  %v3024_v23 = vmul.f32 100.0, %v3012_v61 }
 0x200   : > { %2242 = vpow2.f32 %v1191_v13  ;;  %v1195_v29 = vmul.f32 1.442695, %v1152_v60  ;;  %v1197_v53 = vmul.f32 1.442695, %v1153_v40  ;;  %v1155_v19 = vmin.f32 %v3017_v30, 20.0 }
 0x201   : > { %2244 = vpow2.f32 %v1173_v10  ;;  %v1154_v0 = vmin.f32 %v3021_v28, 20.0  ;;  %v1156_v54 = vmin.f32 %v3024_v23, 20.0  ;;  %v1177_v39 = vmul.f32 1.442695, %v1143_v15 }
 0x202   : > { %2246 = vpow2.f32 %v1195_v29  ;;  %v1201_v42 = vmul.f32 1.442695, %v1155_v19  ;;  %v1179_v37 = vmul.f32 1.442695, %v1144_v4  ;;  %vm1170_vm13 = vcmp.gt.f32.partialorder %v3021_v28, 20.0 }
 0x203   : > { %2248 = vpow2.f32 %v1197_v53  ;;  %v1199_v49 = vmul.f32 1.442695, %v1154_v0  ;;  %v1203_v56 = vmul.f32 1.442695, %v1156_v54  ;;  %vm1169_vm0 = vcmp.gt.f32.partialorder %v3003_v25, 20.0 }
 0x204   : > { %2250 = vpow2.f32 %v1201_v42  ;;  %vm1172_vm2 = vcmp.gt.f32.partialorder %v3024_v23, 20.0 }
 0x205   : > { %v3029_v26 = vpop.eup %2228  ;;  %2252 = vpow2.f32 %v1199_v49 }
 0x206   : > { %v3031_v13 = vpop.eup %2230  ;;  %2254 = vpow2.f32 %v1203_v56  ;;  %v1241_v10 = vadd.f32 1.0, %v3029_v26  ;;  %v1244_v56 = vmul.f32 -0.5, %v3029_v26 }
 0x207   : > { %2256 = vpow2.f32 %v1177_v39  ;;  %v1214_v19 = vadd.f32 1.0, %v3031_v13 }
 0x208   : > { %v3034_v60 = vpop.eup %2232  ;;  %2258 = vpow2.f32 %v1179_v37  ;;  %v3049_v37 = vmul.f32 -0.5, %v3031_v13  ;;  %v3078_v24 = vadd.f32 1.0, %v1244_v56 }
 0x209   : > { %v3036_v40 = vpop.eup %2234  ;;  %v1250_v15 = vadd.f32 1.0, %v3034_v60  ;;  %2260 = vlog2.f32 %v1241_v10  ;;  %v1253_v49 = vmul.f32 -0.5, %v3034_v60  ;;  %v1256_v6 = vand.u32 2147483647, %v3034_v60 }
 0x20a   : > { %v3039_v29 = vpop.eup %2236  ;;  %v1268_v4 = vadd.f32 1.0, %v3036_v40  ;;  %v1274_v7 = vand.u32 2147483647, %v3036_v40 }
 0x20b   : > { %v1277_v53 = vadd.f32 1.0, %v3039_v29  ;;  %2262 = vlog2.f32 %v1250_v15  ;;  %v3044_v0 = vpop.eup %2238  ;;  %v1280_v17 = vmul.f32 -0.5, %v3039_v29  ;;  %v1283_v2 = vand.u32 2147483647, %v3039_v29 }
 0x20c   : > { %2264 = vlog2.f32 %v1268_v4  ;;  %v3046_v54 = vpop.eup %2240  ;;  %v3066_v45 = vadd.f32 1.0, %v3044_v0  ;;  %v3069_v22 = vmul.f32 -0.5, %v3044_v0  ;;  %v1254_v51 = vadd.f32 1.0, %v1253_v49 }
 0x20d   : > { %2266 = vlog2.f32 %v1277_v53  ;;  %v3051_v42 = vpop.eup %2242  ;;  %v1295_v39 = vadd.f32 1.0, %v3046_v54  ;;  %v1271_v53 = vmul.f32 -0.5, %v3036_v40  ;;  %v1281_v41 = vadd.f32 1.0, %v1280_v17 }
 0x20e   : > { %v3057_v15 = vpop.eup %2244  ;;  %v1286_v4 = vadd.f32 1.0, %v3051_v42  ;;  %2268 = vlog2.f32 %v1214_v19  ;;  %v1289_v9 = vmul.f32 -0.5, %v3051_v42  ;;  %v1292_v19 = vand.u32 2147483647, %v3051_v42 }
 0x20f   : > { %3831 = vst [vmem:[#allocation35_spill] sm:$0xff] %v3057_v15  ;;  %v3062_v20 = vpop.eup %2246  ;;  %2270 = vlog2.f32 %v1295_v39  ;;  %v1298_v31 = vmul.f32 -0.5, %v3046_v54  ;;  %vm3089_vm3 = vcmp.lt.f32.partialorder %v1256_v6, 0.0004427343  ;;  %v1301_v63 = vand.u32 2147483647, %v3046_v54 }
 0x210   : > { %v3071_v10 = vpop.eup %2248  ;;  %2272 = vlog2.f32 %v1286_v4  ;;  %v1272_v4 = vadd.f32 1.0, %v1271_v53  ;;  %v1304_v21 = vadd.f32 1.0, %v3062_v20  ;;  %v1290_v3 = vadd.f32 1.0, %v1289_v9 }
 0x211   : > { %v2251_v58 = vpop.eup %2250  ;;  %v1313_v39 = vadd.f32 1.0, %v3071_v10  ;;  %v1316_v49 = vmul.f32 -0.5, %v3071_v10  ;;  %v1319_v5 = vand.u32 2147483647, %v3071_v10  ;;  %vm3099_vm4 = vcmp.lt.f32.partialorder %v1283_v2, 0.0004427343 }
 0x212   : > { %v2253_v35 = vpop.eup %2252  ;;  %v1331_v16 = vadd.f32 1.0, %v2251_v58  ;;  %v1334_v56 = vmul.f32 -0.5, %v2251_v58  ;;  %v1255_v6 = vmul.f32 %v3034_v60, %v1254_v51  ;;  %vm3104_vm5 = vcmp.lt.f32.partialorder %v1274_v7, 0.0004427343 }
 0x213   : > { %v3081_v33 = vpop.eup %2254  ;;  %2274 = vlog2.f32 %v1313_v39  ;;  %v1322_v43 = vadd.f32 1.0, %v2253_v35  ;;  %v1325_v53 = vmul.f32 -0.5, %v2253_v35  ;;  %v3109_v18 = vmul.f32 %v3039_v29, %v1281_v41 }
 0x214   : > { %v3085_v62 = vpop.eup %2256  ;;  %2276 = vlog2.f32 %v1331_v16  ;;  %v1340_v39 = vadd.f32 1.0, %v3081_v33  ;;  %v1307_v16 = vmul.f32 -0.5, %v3062_v20  ;;  %v1299_v57 = vadd.f32 1.0, %v1298_v31 }
 0x215   : > { %3832 = vst [vmem:[#allocation36_spill] sm:$0xff] %v3085_v62  ;;  %v3093_v17 = vpop.eup %2258  ;;  %2278 = vlog2.f32 %v1322_v43  ;;  %v1273_v9 = vmul.f32 %v3036_v40, %v1272_v4  ;;  %v1317_v36 = vadd.f32 1.0, %v1316_v49  ;;  %v1335_v2 = vadd.f32 1.0, %v1334_v56 }
 0x216   : > { %v2261_v27 = vpop.eup %2260  ;;  %2280 = vlog2.f32 %v1340_v39  ;;  %v1337_v62 = vand.u32 2147483647, %v2251_v58  ;;  %vm3112_vm6 = vcmp.lt.f32.partialorder %v1292_v19, 0.0004427343  ;;  %v1326_v7 = vadd.f32 1.0, %v1325_v53 }
 0x217   : > { %2282 = vlog2.f32 %v1304_v21  ;;  %v1328_v60 = vand.u32 2147483647, %v2253_v35  ;;  %v1343_v39 = vmul.f32 -0.5, %v3081_v33  ;;  %vm3117_vm10 = vcmp.lt.f32.partialorder %v1319_v5, 0.0004427343 }
 0x218   : > { %v2263_v43 = vpop.eup %2262  ;;  %v1346_v31 = vand.u32 2147483647, %v3081_v33  ;;  %v1291_v40 = vmul.f32 %v3051_v42, %v1290_v3  ;;  %v1308_v29 = vadd.f32 1.0, %v1307_v16  ;;  %v1310_v4 = vand.u32 2147483647, %v3062_v20 }
 0x219   : > { %v2265_v52 = vpop.eup %2264  ;;  %v1252_v38 = vmul.f32 0.6931472, %v2263_v43  ;;  %vm3124_vm7 = vcmp.lt.f32.partialorder %v1301_v63, 0.0004427343  ;;  %2284 = vlog2.f32 %v3066_v45  ;;  %v1318_v53 = vmul.f32 %v3071_v10, %v1317_v36 }
 0x21a   : > { %v2267_v51 = vpop.eup %2266  ;;  %v1270_v56 = vmul.f32 0.6931472, %v2265_v52  ;;  %v1336_v43 = vmul.f32 %v2251_v58, %v1335_v2  ;;  %vm3130_vm8 = vcmp.lt.f32.partialorder %v1337_v62, 0.0004427343  ;;  %v1243_v3 = vmul.f32 0.6931472, %v2261_v27 }
 0x21b   : > { %v2269_v19 = vpop.eup %2268  ;;  %v1279_v49 = vmul.f32 0.6931472, %v2267_v51  ;;  %v1327_v16 = vmul.f32 %v2253_v35, %v1326_v7  ;;  %vm3134_vm9 = vcmp.lt.f32.partialorder %v1328_v60, 0.0004427343  ;;  %v1344_v63 = vadd.f32 1.0, %v1343_v39  ;;  %v3862_v35 = vld [vmem:[#allocation35_spill] sm:$0xff] }
 0x21c   : > { %v2271_v5 = vpop.eup %2270  ;;  %v1258_v52 = vsel %vm3089_vm3, %v1255_v6, %v1252_v38  ;;  %vm3140_vm12 = vcmp.lt.f32.partialorder %v1346_v31, 0.0004427343  ;;  %v1309_v62 = vmul.f32 %v3062_v20, %v1308_v29  ;;  %v1246_v27 = vmul.f32 %v3029_v26, %v3078_v24 }
 0x21d   : > { %v2273_v42 = vpop.eup %2272  ;;  %vm3148_vm14 = vcmp.lt.f32.partialorder %v1310_v4, 0.0004427343  ;;  %v1285_v32 = vsel %vm3099_vm4, %v3109_v18, %v1279_v49  ;;  %v1300_v36 = vmul.f32 %v3046_v54, %v1299_v57  ;;  %v1276_v38 = vsel %vm3104_vm5, %v1273_v9, %v1270_v56 }
 0x21e   : > { %v1288_v58 = vmul.f32 0.6931472, %v2273_v42  ;;  %v3853_v20 = vand.u32 2147483647, %v3029_v26  ;;  %v1297_v6 = vmul.f32 0.6931472, %v2271_v5 }
 0x21f   : > { %v3165_v2 = vmul.f32 0.01, %v1258_v52  ;;  %v1263_v1 = vadd.f32 1.0, %v3069_v22  ;;  %vm1166_vm3 = vcmp.gt.f32.partialorder %v2987_v59, 20.0  ;;  %v1218_v54 = vadd.f32 1.0, %v3049_v37 }
 0x220   : > { %vm3160_vm15 = vcmp.lt.f32.partialorder %v3853_v20, 0.0004427343  ;;  %v2275_v24 = vpop.eup %2274  ;;  %v1294_v26 = vsel %vm3112_vm6, %v1291_v40, %v1288_v58  ;;  %v1232_v9 = vadd.f32 1.0, %v3093_v17  ;;  %vm1171_vm5 = vcmp.gt.f32.partialorder %v3017_v30, 20.0  ;;  %v3868_v30 = vld [vmem:[#allocation25_spill] sm:$0xff] }
 0x221   : > { %v1249_v18 = vsel %vm3160_vm15, %v1246_v27, %v1243_v3  ;;  %v2277_v57 = vpop.eup %2276  ;;  %v1315_v48 = vmul.f32 0.6931472, %v2275_v24  ;;  %v1345_v22 = vmul.f32 %v3081_v33, %v1344_v63  ;;  %v1357_v39 = vmul.f32 0.01, %v1285_v32 }
 0x222   : > { %v2279_v7 = vpop.eup %2278  ;;  %v1333_v60 = vmul.f32 0.6931472, %v2277_v57  ;;  %v3179_v31 = vmul.f32 0.01, %v1276_v38  ;;  %vm1168_vm6 = vcmp.gt.f32.partialorder %v3000_v44, 20.0  ;;  %vm1162_vm15 = vcmp.gt.f32.partialorder %v2962_v8, 20.0 }
 0x223   : > { %v1321_v29 = vsel %vm3117_vm10, %v1318_v53, %v1315_v48  ;;  %v1324_v14 = vmul.f32 0.6931472, %v2279_v7  ;;  %v1353_v37 = vmul.f32 0.01, %v1249_v18  ;;  %v1216_v40 = vmul.f32 0.6931472, %v2269_v19  ;;  %v2281_v4 = vpop.eup %2280 }
 0x224   : > { %vm1167_vm4 = vcmp.gt.f32.partialorder %v2984_v12, 20.0  ;;  %v1339_v33 = vsel %vm3130_vm8, %v1336_v43, %v1333_v60  ;;  %v1358_v49 = vmul.f32 0.01, %v1294_v26  ;;  %v1303_v41 = vsel %vm3124_vm7, %v1300_v36, %v1297_v6  ;;  %v2283_v56 = vpop.eup %2282  ;;  %v3864_v18 = vld [vmem:[#allocation29_spill] sm:$0xff]  ;;  %v3872_v60 = vld [vmem:[#allocation28_spill] sm:$0xff]  ;;  %v3873_v8 = vld [vmem:[#allocation26_spill] sm:$0xff] }
 0x225   : > { %2286 = vlog2.f32 %v1232_v9  ;;  %v1361_v5 = vmul.f32 0.01, %v1321_v29  ;;  %v1330_v53 = vsel %vm3134_vm9, %v1327_v16, %v1324_v14  ;;  %v1342_v3 = vmul.f32 0.6931472, %v2281_v4  ;;  %v3870_v9 = vld [vmem:[#allocation23_spill] sm:$0xff]  ;;  %v3871_v44 = vld [vmem:[#allocation13_spill] sm:$0xff] }
 0x226   : > { %vm1164_vm10 = vcmp.gt.f32.partialorder %v2965_v11, 20.0  ;;  %v1219_v19 = vmul.f32 %v3031_v13, %v1218_v54  ;;  %v1362_v42 = vmul.f32 0.01, %v1330_v53  ;;  %v1306_v63 = vmul.f32 0.6931472, %v2283_v56  ;;  %v2285_v32 = vpop.eup %2284  ;;  %v3875_v29 = vld [vmem:[#allocation24_spill] sm:$0xff] }
 0x227   : > { %v1264_v15 = vmul.f32 %v3044_v0, %v1263_v1  ;;  %v3856_v43 = vand.u32 2147483647, %v3031_v13  ;;  %v1363_v52 = vmul.f32 0.01, %v1339_v33  ;;  %v1348_v51 = vsel %vm3140_vm12, %v1345_v22, %v1342_v3  ;;  %v3866_v1 = vld [vmem:[#allocation36_spill] sm:$0xff]  ;;  %v3874_v22 = vld [vmem:[#allocation3_spill] sm:$0xff] }
 0x228   : > { %v3859_v16 = vand.u32 2147483647, %v3044_v0  ;;  %v1378_v13 = vsel %vm1170_vm13, %v3009_v55, %v1362_v42  ;;  %v1364_v36 = vmul.f32 0.01, %v1348_v51  ;;  %v1312_v38 = vsel %vm3148_vm14, %v1309_v62, %v1306_v63 }
 0x229   : > { %vm3198_vm8 = vcmp.lt.f32.partialorder %v3856_v43, 0.0004427343  ;;  %v1359_v45 = vmul.f32 0.01, %v1303_v41  ;;  %v1377_v0 = vsel %vm1169_vm0, %v2992_v47, %v1361_v5  ;;  %2134 = vmatprep.subr.msk.mxu0 %vm1398_vm11, %v1378_v13  ;;  %v1360_v20 = vmul.f32 0.01, %v1312_v38 }
 0x22a   : > { %vm3206_vm7 = vcmp.lt.f32.partialorder %v3859_v16, 0.0004427343  ;;  %v1222_v27 = vsel %vm3198_vm8, %v1219_v19, %v1216_v40  ;;  %v1261_v10 = vmul.f32 0.6931472, %v2285_v32  ;;  %v1235_v24 = vmul.f32 -0.5, %v3093_v17  ;;  %2135 = vmatpush1.msk.msra.mxu0 %vm1398_vm11, %v1377_v0  ;;  %v3863_v47 = vld [vmem:[#allocation34_spill] sm:$0xff] }
 0x22b   : > { %v1380_v28 = vsel %vm1172_vm2, %v3012_v61, %v1364_v36  ;;  %v1374_v55 = vsel %vm1166_vm3, %v2980_v34, %v1358_v49  ;;  %v1350_v62 = vmul.f32 0.01, %v1222_v27  ;;  %v1205_v25 = vadd.f32 1.0, %v3862_v35  ;;  %v3867_v34 = vld [vmem:[#allocation32_spill] sm:$0xff]  ;;  %v3876_v41 = vld [vmem:[#allocation33_spill] sm:$0xff]  ;;  %v3877_v5 = vld [vmem:[#allocation30_spill] sm:$0xff] }
 0x22c   : > { %v1379_v6 = vsel %vm1171_vm5, %v3863_v47, %v1363_v52  ;;  %2140 = vmatprep.subr.msk.mxu1 %vm1398_vm11, %v1380_v28  ;;  %1437 = vmatprep.subr.mxu0 %v1374_v55  ;;  %vm3865_vm9 = vcmp.gt.f32.partialorder %v2975_v46, 20.0  ;;  %v1267_v23 = vsel %vm3206_vm7, %v1264_v15, %v1261_v10  ;;  %v1223_v59 = vadd.f32 1.0, %v3866_v1  ;;  %v3869_v46 = vld [vmem:[#allocation31_spill] sm:$0xff]  ;;  %v3878_v27 = vld [vmem:[#allocation9_spill] sm:$0xff]  ;;  %v1381_v13 = vld [vmem:[%s3660_s5] sm:$0xff] }
 0x22d   : > { %v1373_v61 = vsel %vm3865_vm9, %v3864_v18, %v1357_v39  ;;  %2141 = vmatpush1.msk.msra.mxu1 %vm1398_vm11, %v1379_v6  ;;  %v1376_v57 = vsel %vm1168_vm6, %v3867_v34, %v1360_v20  ;;  %v1370_v48 = vsel %vm1162_vm15, %v3868_v30, %v3165_v2  ;;  %v1355_v26 = vmul.f32 0.01, %v1267_v23  ;;  %v3879_v36 = vld [vmem:[#allocation27_spill] sm:$0xff]  ;;  %v3881_v0 = vld [vmem:[#allocation22_spill] sm:$0xff]  ;;  %v1383_v28 = vld [vmem:[%s3660_s5 + $0x10] sm:$0xff] }
 0x22e   : > { %1438 = vmatpush1.msra.mxu0 %v1373_v61  ;;  %2288 = vlog2.f32 %v1205_v25  ;;  %1526 = vmatprep.subr.mxu1 %v1376_v57  ;;  %v1375_v54 = vsel %vm1167_vm4, %v3869_v46, %v1359_v45  ;;  %v1369_v7 = vsel %vm1161_vm1, %v3870_v9, %v1353_v37  ;;  %vm1158_vm11 = vcmp.gt.f32.partialorder %v3871_v44, 20.0  ;;  %v3880_v38 = vld [vmem:[#allocation11_spill] sm:$0xff]  ;;  %v1384_v55 = vld [vmem:[%s3660_s5 + $0x18] sm:$0xff]  ;;  %v3883_v47 = vld [vmem:[#allocation20_spill] sm:$0xff] }
 0x22f   : > { %1439 = vmatprep.subr.mxu0 %v1370_v48  ;;  %2290 = vlog2.f32 %v1223_v59  ;;  %vm1163_vm12 = vcmp.gt.f32.partialorder %v3872_v60, 20.0  ;;  %1527 = vmatpush1.msra.mxu1 %v1375_v54  ;;  %v1372_v2 = vsel %vm1164_vm10, %v3873_v8, %v3179_v31  ;;  %v1366_v12 = vsel %vm1158_vm11, %v3874_v22, %v1350_v62  ;;  %v3304_v62 = vpop.permute.xlu1 %1605  ;;  %v3884_v59 = vld [vmem:[#allocation16_spill] sm:$0xff]  ;;  %v3886_v48 = vld [vmem:[#allocation21_spill] sm:$0xff]  ;;  %v3890_v22 = vld [vmem:[#allocation7_spill] sm:$0xff] }
 0x230   : > { %1440 = vmatpush1.msra.mxu0 %v1369_v7  ;;  %v1236_v39 = vadd.f32 1.0, %v1235_v24  ;;  %1528 = vmatprep.subr.mxu1 %v1372_v2  ;;  %v1371_v14 = vsel %vm1163_vm12, %v3875_v29, %v1355_v26  ;;  %v1238_v50 = vand.u32 2147483647, %v3093_v17  ;;  %v1208_v33 = vmul.f32 -0.5, %v3862_v35  ;;  %v1382_v24 = vld [vmem:[%s3660_s5 + $0x8] sm:$0xff]  ;;  %v3887_v9 = vld [vmem:[#allocation12_spill] sm:$0xff] }
 0x231   : > { %1441 = vmatprep.subr.mxu0 %v1366_v12  ;;  %1529 = vmatpush1.msra.mxu1 %v1371_v14  ;;  %v1226_v11 = vmul.f32 -0.5, %v3866_v1  ;;  %vm1160_vm13 = vcmp.gt.f32.partialorder %v3876_v41, 20.0  ;;  %v1211_v3 = vand.u32 2147483647, %v3862_v35  ;;  %v1229_v42 = vand.u32 2147483647, %v3866_v1 }
 0x232   : > { %v2287_v37 = vpop.eup %2286  ;;  %v1237_v4 = vmul.f32 %v3093_v17, %v1236_v39  ;;  %vm1239_vm1 = vcmp.lt.f32.partialorder %v1238_v50, 0.0004427343  ;;  %v1209_v56 = vadd.f32 1.0, %v1208_v33  ;;  %vm1157_vm2 = vcmp.gt.f32.partialorder %v3878_v27, 20.0  ;;  %v3888_v44 = vld [vmem:[#allocation17_spill] sm:$0xff]  ;;  %v3892_v14 = vld [vmem:[#allocation18_spill] sm:$0xff] }
 0x233   : > { %v1234_v40 = vmul.f32 0.6931472, %v2287_v37  ;;  %v1227_v19 = vadd.f32 1.0, %v1226_v11  ;;  %vm1212_vm14 = vcmp.lt.f32.partialorder %v1211_v3, 0.0004427343  ;;  %vm1385_vm3 = vcmask 236544  }
 0x234   : > { %v1210_v43 = vmul.f32 %v3862_v35, %v1209_v56  ;;  %vm1230_vm0 = vcmp.lt.f32.partialorder %v1229_v42, 0.0004427343  ;;  %vm1159_vm4 = vcmp.gt.f32.partialorder %v3879_v36, 20.0  ;;  %v3882_v10 = vmov 0.0   ;;  %v3306_v35 = vpop.permute.xlu0 %1610  ;;  %v3903_v27 = vld [vmem:[#allocation5_spill] sm:$0xff] }
 0x235   : > { %v1240_v31 = vsel %vm1239_vm1, %v1237_v4, %v1234_v40  ;;  %v1228_v52 = vmul.f32 %v3866_v1, %v1227_v19  ;;  %v1596_v1 = vpop.permute.xlu1 %1595  ;;  %v3894_v40 = vld [vmem:[#allocation15_spill] sm:$0xff] }
 0x236   : > { %v1352_v49 = vmul.f32 0.01, %v1240_v31 }
 0x238   : > { %v1368_v53 = vsel %vm1160_vm13, %v3877_v5, %v1352_v49  ;;  %v1601_v54 = vpop.permute.xlu0 %1600 }
 0x239   : > { %1530 = vmatprep.subr.mxu1 %v1368_v53 }
 0x23b   : > { %v2289_v63 = vpop.eup %2288 }
 0x23c   : > { %v2291_v17 = vpop.eup %2290  ;;  %v1207_v15 = vmul.f32 0.6931472, %v2289_v63 }
 0x23d   : > { %v1225_v21 = vmul.f32 0.6931472, %v2291_v17 }
 0x23e   : > { %v1213_v51 = vsel %vm1212_vm14, %v1210_v43, %v1207_v15 }
 0x23f   : > { %v1349_v16 = vmul.f32 0.01, %v1213_v51  ;;  %v1231_v58 = vsel %vm1230_vm0, %v1228_v52, %v1225_v21 }
 0x240   : > { %v1351_v32 = vmul.f32 0.01, %v1231_v58 }
 0x241   : > { %v1365_v45 = vsel %vm1157_vm2, %v3880_v38, %v1349_v16 }
 0x242   : > { %1442 = vmatpush1.msra.mxu0 %v1365_v45  ;;  %v1367_v20 = vsel %vm1159_vm4, %v3881_v0, %v1351_v32  ;;  %v3905_v0 = vld [vmem:[#allocation4_spill] sm:$0xff] }
 0x243   : > { %1531 = vmatpush1.msra.mxu1 %v1367_v20  ;;  %2136 = vmatmul.mubr.msk.f32.vlgmr.msra.gmra.mxu0 %vm1385_vm3, %v1381_v13 }
 0x244   : > { %2142 = vmatmul.mubr.msk.f32.vlgmr.msra.gmra.mxu1 %vm1385_vm3, %v1381_v13  ;;  %1481 = vmatprep.mubr.f32.mxu0 %v3882_v10 }
 0x245   : > { %1570 = vmatprep.mubr.f32.mxu1 %v3882_v10 }
 0x247   : > { %2137 = vmatmul.mubr.msk.f32.gmra.mxu0 %vm1385_vm3, %v1382_v24 }
 0x248   : > { %2143 = vmatmul.mubr.msk.f32.gmra.mxu1 %vm1385_vm3, %v1382_v24  ;;  %1487 = vmatprep.mubr.f32.mxu0 %v3882_v10 }
 0x249   : > { %1576 = vmatprep.mubr.f32.mxu1 %v3882_v10 }
 0x24b   : > { %2138 = vmatmul.mubr.msk.f32.gmra.mxu0 %vm1385_vm3, %v1383_v28 }
 0x24c   : > { %2144 = vmatmul.mubr.msk.f32.gmra.mxu1 %vm1385_vm3, %v1383_v28  ;;  %1493 = vmatprep.mubr.f32.mxu0 %v3882_v10  ;;  %v3907_v28 = vld [vmem:[#allocation10_spill] sm:$0xff] }
 0x24d   : > { %1582 = vmatprep.mubr.f32.mxu1 %v3882_v10 }
 0x24f   : > { %2139 = vmatmul.mubr.msk.f32.gmra.mxu0 %vm1385_vm3, %v1384_v55 }
 0x250   : > { %2145 = vmatmul.mubr.msk.f32.gmra.mxu1 %vm1385_vm3, %v1384_v55  ;;  %1959 = vmatprep.mubr.f32.mxu0 %v3882_v10 }
 0x251   : > { %2030 = vmatprep.mubr.f32.mxu1 %v3882_v10 }
 0x303   : > { %v1477_v25 = vpop.f32.mrf.mxu0 }
 0x304   : > { %v1478_v6 = vadd.f32 %v1477_v25, %v3883_v47  ;;  %v1566_v18 = vpop.f32.mrf.mxu1 }
 0x305   : > { %v1479_v61 = vpop.f32.mrf.mxu0  ;;  %v1567_v34 = vadd.f32 %v1566_v18, %v3884_v59  ;;  %v3910_v59 = vld [vmem:[#allocation2_spill] sm:$0xff] }
 0x306   : > { %v1568_v23 = vpop.f32.mrf.mxu1  ;;  %v3310_v30 = vadd.f32 %v1596_v1, %v1478_v6  ;;  %v1480_v7 = vadd.f32 %v1479_v61, %v3887_v9  ;;  %v3909_v6 = vld [vmem:[#allocation8_spill] sm:$0xff] }
 0x307   : > { %v1483_v57 = vpop.f32.mrf.mxu0  ;;  %v3318_v29 = vadd.f32 %v1596_v1, %v1567_v34  ;;  %v1569_v50 = vadd.f32 %v1568_v23, %v3892_v14 }
 0x308   : > { %3885 = vst [vmem:[#allocation35_spill] sm:$0xff] %v3310_v30  ;;  %v1484_v26 = vadd.f32 %v1483_v57, %v3886_v48  ;;  %v1572_v46 = vpop.f32.mrf.mxu1  ;;  %v3325_v11 = vmul.f32 100.0, %v3310_v30  ;;  %v3332_v56 = vadd.f32 %v1596_v1, %v1480_v7 }
 0x309   : > { %v1573_v60 = vadd.f32 %v1572_v46, %v3888_v44  ;;  %v1485_v8 = vpop.f32.mrf.mxu0  ;;  %3891 = vst [vmem:[#allocation29_spill] sm:$0xff] %v3318_v29  ;;  %v3344_v17 = vmul.f32 100.0, %v3318_v29  ;;  %v3346_v15 = vadd.f32 %v1596_v1, %v1569_v50  ;;  %v3912_v46 = vld [vmem:[#allocation6_spill] sm:$0xff] }
 0x30a   : > { %v3315_v2 = vadd.f32 %v1601_v54, %v1484_v26  ;;  %v1486_v12 = vadd.f32 %v1485_v8, %v3890_v22  ;;  %v1574_v39 = vpop.f32.mrf.mxu1  ;;  %3895 = vst [vmem:[#allocation32_spill] sm:$0xff] %v3325_v11  ;;  %3897 = vst [vmem:[#allocation31_spill] sm:$0xff] %v3332_v56  ;;  %v1645_v51 = vmin.f32 %v3325_v11, 20.0  ;;  %v3356_v36 = vmul.f32 100.0, %v3332_v56 }
 0x30b   : > { %v3321_v37 = vadd.f32 %v1601_v54, %v1573_v60  ;;  %v1575_v4 = vadd.f32 %v1574_v39, %v3894_v40  ;;  %v1489_v33 = vpop.f32.mrf.mxu0  ;;  %3900 = vst [vmem:[#allocation28_spill] sm:$0xff] %v3344_v17  ;;  %3901 = vst [vmem:[#allocation26_spill] sm:$0xff] %v3346_v15  ;;  %v3913_v60 = vld [vmem:[#allocation19_spill] sm:$0xff]  ;;  %v3914_v39 = vld [vmem:[#allocation14_spill] sm:$0xff] }
 0x30c   : > { %3889 = vst [vmem:[#allocation34_spill] sm:$0xff] %v3315_v2  ;;  %v3328_v31 = vmul.f32 100.0, %v3315_v2  ;;  %v3330_v49 = vadd.f32 %v1601_v54, %v1486_v12  ;;  %v1578_v41 = vpop.f32.mrf.mxu1  ;;  %v1490_v32 = vadd.f32 %v1489_v33, %v3903_v27  ;;  %3904 = vst [vmem:[#allocation24_spill] sm:$0xff] %v3356_v36 }
 0x30d   : > { %3893 = vst [vmem:[#allocation36_spill] sm:$0xff] %v3321_v37  ;;  %v3335_v5 = vmul.f32 100.0, %v3321_v37  ;;  %v3337_v53 = vadd.f32 %v1601_v54, %v1575_v4  ;;  %v1491_v3 = vpop.f32.mrf.mxu0  ;;  %v1579_v20 = vadd.f32 %v1578_v41, %v3905_v0 }
 0x30e   : > { %3896 = vst [vmem:[#allocation25_spill] sm:$0xff] %v3330_v49  ;;  %v1649_v19 = vmin.f32 %v3328_v31, 20.0  ;;  %v3341_v42 = vmul.f32 100.0, %v3330_v49  ;;  %v1580_v63 = vpop.f32.mrf.mxu1  ;;  %v3361_v24 = vadd.f32 %v3304_v62, %v1490_v32  ;;  %v1492_v55 = vadd.f32 %v1491_v3, %v3907_v28 }
 0x30f   : > { %3898 = vst [vmem:[#allocation23_spill] sm:$0xff] %v3335_v5  ;;  %3899 = vst [vmem:[#allocation13_spill] sm:$0xff] %v3337_v53  ;;  %v1651_v43 = vmin.f32 %v3335_v5, 20.0  ;;  %v3350_v21 = vmul.f32 100.0, %v3337_v53  ;;  %v1495_v52 = vpop.f32.mrf.mxu0  ;;  %v3365_v47 = vadd.f32 %v3304_v62, %v1579_v20  ;;  %v1581_v18 = vadd.f32 %v1580_v63, %v3909_v6 }
 0x310   : > { %v1685_v16 = vmul.f32 1.442695, %v1649_v19  ;;  %v1650_v58 = vmin.f32 %v3341_v42, 20.0  ;;  %v1584_v13 = vpop.f32.mrf.mxu1  ;;  %3906 = vst [vmem:[#allocation33_spill] sm:$0xff] %v3361_v24  ;;  %v3369_v23 = vmul.f32 100.0, %v3361_v24  ;;  %v3372_v1 = vadd.f32 %v3304_v62, %v1492_v55 }
 0x311   : > { %3902 = vst [vmem:[#allocation3_spill] sm:$0xff] %v3350_v21  ;;  %v1689_v38 = vmul.f32 1.442695, %v1651_v43  ;;  %v1652_v45 = vmin.f32 %v3350_v21, 20.0  ;;  %3908 = vst [vmem:[#allocation30_spill] sm:$0xff] %v3365_v47  ;;  %v1497_v61 = vpop.f32.mrf.mxu0  ;;  %v1496_v34 = vadd.f32 %v1495_v52, %v3910_v59  ;;  %v3376_v48 = vmul.f32 100.0, %v3365_v47 }
 0x312   : > { %2292 = vpow2.f32 %v1685_v16  ;;  %v1687_v10 = vmul.f32 1.442695, %v1650_v58  ;;  %v1586_v57 = vpop.f32.mrf.mxu1  ;;  %v3379_v26 = vadd.f32 %v3304_v62, %v1581_v18  ;;  %v1585_v54 = vadd.f32 %v1584_v13, %v3912_v46 }
 0x313   : > { %2294 = vpow2.f32 %v1689_v38  ;;  %v1691_v25 = vmul.f32 1.442695, %v1652_v45  ;;  %v1653_v9 = vmin.f32 %v3369_v23, 20.0  ;;  %v3384_v7 = vmul.f32 100.0, %v3372_v1 }
 0x314   : > { %2296 = vpow2.f32 %v1687_v10  ;;  %3911 = vst [vmem:[#allocation9_spill] sm:$0xff] %v3379_v26  ;;  %v3387_v44 = vadd.f32 %v3306_v35, %v1496_v34  ;;  %v1498_v8 = vadd.f32 %v1497_v61, %v3913_v60  ;;  %v1655_v22 = vmin.f32 %v3376_v48, 20.0 }
 0x315   : > { %2298 = vpow2.f32 %v1691_v25  ;;  %v3392_v12 = vmul.f32 100.0, %v3379_v26  ;;  %v3395_v62 = vadd.f32 %v3306_v35, %v1585_v54  ;;  %v1587_v14 = vadd.f32 %v1586_v57, %v3914_v39 }
 0x316   : > { %v1693_v50 = vmul.f32 1.442695, %v1653_v9  ;;  %v1654_v40 = vmin.f32 %v3384_v7, 20.0  ;;  %v3400_v4 = vmul.f32 100.0, %v3387_v44  ;;  %v3403_v33 = vadd.f32 %v3306_v35, %v1498_v8 }
 0x317   : > { %v1697_v41 = vmul.f32 1.442695, %v1655_v22  ;;  %v1656_v3 = vmin.f32 %v3392_v12, 20.0  ;;  %v3407_v19 = vmul.f32 100.0, %v3395_v62  ;;  %v3410_v63 = vadd.f32 %v3306_v35, %v1587_v14 }
 0x318   : > { %2300 = vpow2.f32 %v1693_v50  ;;  %v1695_v43 = vmul.f32 1.442695, %v1654_v40  ;;  %v1657_v52 = vmin.f32 %v3400_v4, 20.0  ;;  %v3414_v16 = vmul.f32 100.0, %v3403_v33 }
 0x319   : > { %2302 = vpow2.f32 %v1697_v41  ;;  %v1699_v58 = vmul.f32 1.442695, %v1656_v3  ;;  %v1659_v27 = vmin.f32 %v3407_v19, 20.0  ;;  %v3418_v32 = vmul.f32 100.0, %v3410_v63 }
 0x31a   : > { %v1647_v13 = vmin.f32 %v3344_v17, 20.0  ;;  %2304 = vpow2.f32 %v1695_v43  ;;  %v1701_v38 = vmul.f32 1.442695, %v1657_v52  ;;  %v1658_v35 = vmin.f32 %v3414_v16, 20.0 }
 0x31b   : > { %v3423_v45 = vmul.f32 100.0, %v3346_v15  ;;  %2306 = vpow2.f32 %v1699_v58  ;;  %v1705_v0 = vmul.f32 1.442695, %v1659_v27  ;;  %v1660_v20 = vmin.f32 %v3418_v32, 20.0 }
 0x31c   : > { %2308 = vpow2.f32 %v1701_v38  ;;  %v1703_v10 = vmul.f32 1.442695, %v1658_v35  ;;  %v1677_v55 = vmul.f32 1.442695, %v1645_v51  ;;  %v1646_v25 = vmin.f32 %v3356_v36, 20.0 }
 0x31d   : > { %3915 = vst [vmem:[#allocation27_spill] sm:$0xff] %v3423_v45  ;;  %2310 = vpow2.f32 %v1705_v0  ;;  %v1707_v6 = vmul.f32 1.442695, %v1660_v20  ;;  %v1681_v61 = vmul.f32 1.442695, %v1647_v13  ;;  %v1648_v34 = vmin.f32 %v3423_v45, 20.0 }
 0x31e   : > { %2312 = vpow2.f32 %v1703_v10  ;;  %v1679_v54 = vmul.f32 1.442695, %v1646_v25  ;;  %vm1674_vm12 = vcmp.gt.f32.partialorder %v3414_v16, 20.0  ;;  %vm1676_vm13 = vcmp.gt.f32.partialorder %v3418_v32, 20.0 }
 0x31f   : > { %v3426_v28 = vpop.eup %2292  ;;  %2314 = vpow2.f32 %v1707_v6  ;;  %v1683_v60 = vmul.f32 1.442695, %v1648_v34  ;;  %vm1673_vm14 = vcmp.gt.f32.partialorder %v3400_v4, 20.0  ;;  %vm1675_vm2 = vcmp.gt.f32.partialorder %v3407_v19, 20.0 }
 0x320   : > { %v3429_v18 = vpop.eup %2294  ;;  %2316 = vpow2.f32 %v1677_v55  ;;  %v1745_v51 = vadd.f32 1.0, %v3426_v28  ;;  %v1748_v22 = vmul.f32 -0.5, %v3426_v28  ;;  %v1751_v55 = vand.u32 2147483647, %v3426_v28 }
 0x321   : > { %v2297_v59 = vpop.eup %2296  ;;  %2318 = vpow2.f32 %v1681_v61  ;;  %v1763_v39 = vadd.f32 1.0, %v3429_v18  ;;  %v1766_v34 = vmul.f32 -0.5, %v3429_v18 }
 0x322   : > { %v3432_v57 = vpop.eup %2298  ;;  %v1754_v46 = vadd.f32 1.0, %v2297_v59  ;;  %v1757_v8 = vmul.f32 -0.5, %v2297_v59  ;;  %v1749_v52 = vadd.f32 1.0, %v1748_v22  ;;  %v1760_v38 = vand.u32 2147483647, %v2297_v59 }
 0x323   : > { %v1772_v9 = vadd.f32 1.0, %v3432_v57  ;;  %v1775_v41 = vmul.f32 -0.5, %v3432_v57  ;;  %v1778_v35 = vand.u32 2147483647, %v3432_v57  ;;  %vm3489_vm15 = vcmp.lt.f32.partialorder %v1751_v55, 0.0004427343 }
 0x324   : > { %2320 = vlog2.f32 %v1754_v46  ;;  %v1758_v43 = vadd.f32 1.0, %v1757_v8  ;;  %v3459_v61 = vmul.f32 %v3426_v28, %v1749_v52  ;;  %vm3476_vm5 = vcmp.lt.f32.partialorder %v1760_v38, 0.0004427343 }
 0x325   : > { %2322 = vlog2.f32 %v1772_v9  ;;  %v3438_v14 = vpop.eup %2300  ;;  %v1776_v10 = vadd.f32 1.0, %v1775_v41  ;;  %vm3480_vm6 = vcmp.lt.f32.partialorder %v1778_v35, 0.0004427343 }
 0x326   : > { %2324 = vpow2.f32 %v1679_v54  ;;  %v3440_v50 = vpop.eup %2302  ;;  %v1781_v40 = vadd.f32 1.0, %v3438_v14  ;;  %v3456_v6 = vmul.f32 %v2297_v59, %v1758_v43  ;;  %v3941_v59 = vand.u32 2147483647, %v3429_v18 }
 0x327   : > { %2326 = vlog2.f32 %v1745_v51  ;;  %v3444_v3 = vpop.eup %2304  ;;  %v1802_v43 = vmul.f32 -0.5, %v3440_v50  ;;  %v1777_v24 = vmul.f32 %v3432_v57, %v1776_v10 }
 0x328   : > { %2328 = vpow2.f32 %v1683_v60  ;;  %v3446_v58 = vpop.eup %2306  ;;  %v1790_v27 = vadd.f32 1.0, %v3444_v3  ;;  %v1784_v60 = vmul.f32 -0.5, %v3438_v14  ;;  %v1793_v46 = vmul.f32 -0.5, %v3444_v3 }
 0x329   : > { %2330 = vlog2.f32 %v1763_v39  ;;  %v3449_v13 = vpop.eup %2308  ;;  %v1808_v22 = vadd.f32 1.0, %v3446_v58  ;;  %v1799_v39 = vadd.f32 1.0, %v3440_v50  ;;  %v1796_v17 = vand.u32 2147483647, %v3444_v3 }
 0x32a   : > { %2332 = vlog2.f32 %v1781_v40  ;;  %v3452_v0 = vpop.eup %2310  ;;  %v1817_v20 = vadd.f32 1.0, %v3449_v13  ;;  %v1820_v41 = vmul.f32 -0.5, %v3449_v13  ;;  %v1811_v30 = vmul.f32 -0.5, %v3446_v58 }
 0x32b   : > { %2334 = vlog2.f32 %v1790_v27  ;;  %v2313_v25 = vpop.eup %2312  ;;  %v1835_v51 = vadd.f32 1.0, %v3452_v0  ;;  %v1823_v45 = vand.u32 2147483647, %v3449_v13  ;;  %v1814_v38 = vand.u32 2147483647, %v3446_v58 }
 0x32c   : > { %v2315_v54 = vpop.eup %2314  ;;  %v1826_v9 = vadd.f32 1.0, %v2313_v25  ;;  %2336 = vlog2.f32 %v1817_v20  ;;  %v1829_v40 = vmul.f32 -0.5, %v2313_v25  ;;  %v1838_v20 = vmul.f32 -0.5, %v3452_v0 }
 0x32d   : > { %v1844_v8 = vadd.f32 1.0, %v2315_v54  ;;  %v3468_v28 = vpop.eup %2316  ;;  %v1847_v27 = vmul.f32 -0.5, %v2315_v54  ;;  %v1832_v15 = vand.u32 2147483647, %v2313_v25  ;;  %v1850_v36 = vand.u32 2147483647, %v2315_v54 }
 0x32e   : > { %3916 = vst [vmem:[#allocation11_spill] sm:$0xff] %v3468_v28  ;;  %2338 = vlog2.f32 %v1826_v9  ;;  %v3472_v52 = vpop.eup %2318  ;;  %v1821_v37 = vadd.f32 1.0, %v1820_v41  ;;  %v1841_v5 = vand.u32 2147483647, %v3452_v0  ;;  %v1839_v47 = vadd.f32 1.0, %v1838_v20 }
 0x32f   : > { %3917 = vst [vmem:[#allocation22_spill] sm:$0xff] %v3472_v52  ;;  %2340 = vlog2.f32 %v1844_v8  ;;  %v1805_v8 = vand.u32 2147483647, %v3440_v50  ;;  %v1848_v52 = vadd.f32 1.0, %v1847_v27  ;;  %v1794_v2 = vadd.f32 1.0, %v1793_v46 }
 0x330   : > { %2342 = vlog2.f32 %v1835_v51  ;;  %v1830_v51 = vadd.f32 1.0, %v1829_v40  ;;  %vm3499_vm10 = vcmp.lt.f32.partialorder %v1832_v15, 0.0004427343  ;;  %vm3503_vm8 = vcmp.lt.f32.partialorder %v1823_v45, 0.0004427343 }
 0x331   : > { %v2321_v9 = vpop.eup %2320  ;;  %2344 = vlog2.f32 %v1808_v22  ;;  %v1785_v22 = vadd.f32 1.0, %v1784_v60  ;;  %v1812_v41 = vadd.f32 1.0, %v1811_v30  ;;  %v1767_v27 = vadd.f32 1.0, %v1766_v34 }
 0x332   : > { %v2323_v11 = vpop.eup %2322  ;;  %2346 = vlog2.f32 %v1799_v39  ;;  %v1756_v49 = vmul.f32 0.6931472, %v2321_v9  ;;  %v1831_v39 = vmul.f32 %v2313_v25, %v1830_v51  ;;  %vm3507_vm7 = vcmp.lt.f32.partialorder %v1850_v36, 0.0004427343 }
 0x333   : > { %v3493_v56 = vpop.eup %2324  ;;  %v1774_v55 = vmul.f32 0.6931472, %v2323_v11  ;;  %v1822_v11 = vmul.f32 %v3449_v13, %v1821_v37  ;;  %v1803_v57 = vadd.f32 1.0, %v1802_v43  ;;  %v1849_v60 = vmul.f32 %v2315_v54, %v1848_v52 }
 0x334   : > { %v2327_v53 = vpop.eup %2326  ;;  %v1840_v9 = vmul.f32 %v3452_v0, %v1839_v47  ;;  %vm3513_vm9 = vcmp.lt.f32.partialorder %v1841_v5, 0.0004427343  ;;  %v1795_v30 = vmul.f32 %v3444_v3, %v1794_v2  ;;  %vm3518_vm11 = vcmp.lt.f32.partialorder %v1796_v17, 0.0004427343  ;;  %v3952_v0 = vld [vmem:[#allocation34_spill] sm:$0xff] }
 0x335   : > { %v3496_v21 = vpop.eup %2328  ;;  %v1747_v10 = vmul.f32 0.6931472, %v2327_v53  ;;  %vm3523_vm1 = vcmp.lt.f32.partialorder %v1814_v38, 0.0004427343  ;;  %v1786_v53 = vmul.f32 %v3438_v14, %v1785_v22  ;;  %v1762_v5 = vsel %vm3476_vm5, %v3456_v6, %v1756_v49  ;;  %v3945_v32 = vld [vmem:[#allocation11_spill] sm:$0xff] }
 0x336   : > { %v2331_v26 = vpop.eup %2330  ;;  %v1780_v2 = vsel %vm3480_vm6, %v1777_v24, %v1774_v55  ;;  %v1813_v47 = vmul.f32 %v3446_v58, %v1812_v41  ;;  %v3936_v13 = vand.u32 2147483647, %v3438_v14  ;;  %v1804_v29 = vmul.f32 %v3440_v50, %v1803_v57  ;;  %v3954_v49 = vld [vmem:[#allocation22_spill] sm:$0xff] }
 0x337   : > { %v2333_v46 = vpop.eup %2332  ;;  %v1765_v34 = vmul.f32 0.6931472, %v2331_v26  ;;  %vm3545_vm4 = vcmp.lt.f32.partialorder %v1805_v8, 0.0004427343  ;;  %v1753_v24 = vsel %vm3489_vm15, %v3459_v61, %v1747_v10  ;;  %v1718_v14 = vadd.f32 1.0, %v3493_v56 }
 0x338   : > { %v2335_v15 = vpop.eup %2334  ;;  %v1783_v3 = vmul.f32 0.6931472, %v2333_v46  ;;  %vm3538_vm0 = vcmp.lt.f32.partialorder %v3936_v13, 0.0004427343  ;;  %v1858_v26 = vmul.f32 0.01, %v1762_v5  ;;  %v1768_v50 = vmul.f32 %v3429_v18, %v1767_v27 }
 0x339   : > { %v1792_v36 = vmul.f32 0.6931472, %v2335_v15  ;;  %v2337_v17 = vpop.eup %2336  ;;  %v3555_v6 = vmul.f32 0.01, %v1780_v2  ;;  %vm3560_vm3 = vcmp.lt.f32.partialorder %v3941_v59, 0.0004427343  ;;  %2348 = vlog2.f32 %v1718_v14 }
 0x33a   : > { %v1819_v54 = vmul.f32 0.6931472, %v2337_v17  ;;  %vm1666_vm15 = vcmp.gt.f32.partialorder %v3341_v42, 20.0  ;;  %vm1665_vm6 = vcmp.gt.f32.partialorder %v3328_v31, 20.0  ;;  %v1789_v18 = vsel %vm3538_vm0, %v1786_v53, %v1783_v3  ;;  %v3951_v13 = vld [vmem:[#allocation3_spill] sm:$0xff]  ;;  %v3955_v42 = vld [vmem:[#allocation13_spill] sm:$0xff] }
 0x33b   : > { %v2339_v58 = vpop.eup %2338  ;;  %v1798_v38 = vsel %vm3518_vm11, %v1795_v30, %v1792_v36  ;;  %vm1671_vm5 = vcmp.gt.f32.partialorder %v3376_v48, 20.0  ;;  %v1857_v22 = vmul.f32 0.01, %v1753_v24  ;;  %v1771_v55 = vsel %vm3560_vm3, %v1768_v50, %v1765_v34 }
 0x33c   : > { %v2341_v52 = vpop.eup %2340  ;;  %v1828_v61 = vmul.f32 0.6931472, %v2339_v58  ;;  %v1825_v8 = vsel %vm3503_vm8, %v1822_v11, %v1819_v54  ;;  %v1736_v11 = vadd.f32 1.0, %v3496_v21  ;;  %v1862_v15 = vmul.f32 0.01, %v1798_v38  ;;  %v3956_v58 = vld [vmem:[#allocation23_spill] sm:$0xff] }
 0x33d   : > { %v2343_v35 = vpop.eup %2342  ;;  %v1846_v51 = vmul.f32 0.6931472, %v2341_v52  ;;  %v1865_v27 = vmul.f32 0.01, %v1825_v8  ;;  %v1861_v5 = vmul.f32 0.01, %v1789_v18  ;;  %v1873_v34 = vsel %vm1665_vm6, %v3952_v0, %v1857_v22 }
 0x33e   : > { %v2345_v40 = vpop.eup %2344  ;;  %v1834_v41 = vsel %vm3499_vm10, %v1831_v39, %v1828_v61  ;;  %v1837_v46 = vmul.f32 0.6931472, %v2343_v35  ;;  %2350 = vlog2.f32 %v1736_v11  ;;  %v1721_v45 = vmul.f32 -0.5, %v3493_v56 }
 0x33f   : > { %v1866_v57 = vmul.f32 0.01, %v1834_v41  ;;  %v1852_v10 = vsel %vm3507_vm7, %v1849_v60, %v1846_v51  ;;  %v1810_v30 = vmul.f32 0.6931472, %v2345_v40  ;;  %v2347_v25 = vpop.eup %2346  ;;  %v1881_v60 = vsel %vm1673_vm14, %v3387_v44, %v1865_v27  ;;  %v3946_v44 = vld [vmem:[#allocation9_spill] sm:$0xff]  ;;  %v3958_v51 = vld [vmem:[#allocation24_spill] sm:$0xff] }
 0x340   : > { %v1868_v36 = vmul.f32 0.01, %v1852_v10  ;;  %v1843_v53 = vsel %vm3513_vm9, %v1840_v9, %v1837_v46  ;;  %v1801_v17 = vmul.f32 0.6931472, %v2347_v25  ;;  %vm3944_vm10 = vcmp.gt.f32.partialorder %v3384_v7, 20.0  ;;  %v3959_v40 = vld [vmem:[#allocation31_spill] sm:$0xff] }
 0x341   : > { %v1882_v28 = vsel %vm1674_vm12, %v3403_v33, %v1866_v57  ;;  %v1867_v39 = vmul.f32 0.01, %v1843_v53  ;;  %v1816_v2 = vsel %vm3523_vm1, %v1813_v47, %v1810_v30  ;;  %v1878_v16 = vsel %vm3944_vm10, %v3372_v1, %v1862_v15  ;;  %v3948_v47 = vld [vmem:[#allocation33_spill] sm:$0xff]  ;;  %v3960_v10 = vld [vmem:[#allocation27_spill] sm:$0xff]  ;;  %v3961_v30 = vld [vmem:[#allocation26_spill] sm:$0xff] }
 0x342   : > { %1919 = vmatprep.subr.mxu0 %v1882_v28  ;;  %v1884_v20 = vsel %vm1676_vm13, %v3410_v63, %v1868_v36  ;;  %v1864_v9 = vmul.f32 0.01, %v1816_v2  ;;  %v1807_v63 = vsel %vm3545_vm4, %v1804_v29, %v1801_v17  ;;  %v1709_v37 = vadd.f32 1.0, %v3945_v32  ;;  %v3950_v1 = vld [vmem:[#allocation25_spill] sm:$0xff] }
 0x343   : > { %1990 = vmatprep.subr.mxu1 %v1884_v20  ;;  %1920 = vmatpush1.msra.mxu0 %v1881_v60  ;;  %v1883_v33 = vsel %vm1675_vm2, %v3395_v62, %v1867_v39  ;;  %vm3947_vm8 = vcmp.gt.f32.partialorder %v3392_v12, 20.0  ;;  %vm3949_vm7 = vcmp.gt.f32.partialorder %v3369_v23, 20.0  ;;  %v1863_v62 = vmul.f32 0.01, %v1807_v63  ;;  %v3953_v12 = vld [vmem:[#allocation30_spill] sm:$0xff]  ;;  %v3962_v20 = vld [vmem:[#allocation32_spill] sm:$0xff] }
 0x344   : > { %1991 = vmatpush1.msra.mxu1 %v1883_v33  ;;  %1921 = vmatprep.subr.mxu0 %v1878_v16  ;;  %v1880_v4 = vsel %vm3947_vm8, %v3946_v44, %v1864_v9  ;;  %v1877_v19 = vsel %vm3949_vm7, %v3948_v47, %v1861_v5  ;;  %v1859_v3 = vmul.f32 0.01, %v1771_v55  ;;  %v1874_v7 = vsel %vm1666_vm15, %v3950_v1, %v1858_v26  ;;  %v3957_v26 = vld [vmem:[#allocation36_spill] sm:$0xff]  ;;  %v1885_v60 = vld [vmem:[%s3662_s7] sm:$0x1f]  ;;  %v3963_v9 = vld [vmem:[#allocation35_spill] sm:$0xff]  ;;  %v1890_v44 = vpop.permute.xlu0 %1889 }
 0x345   : > { %1992 = vmatprep.subr.mxu1 %v1880_v4  ;;  %1922 = vmatpush1.msra.mxu0 %v1877_v19  ;;  %vm1668_vm9 = vcmp.gt.f32.partialorder %v3951_v13, 20.0  ;;  %2352 = vlog2.f32 %v1709_v37  ;;  %v1879_v23 = vsel %vm1671_vm5, %v3953_v12, %v1863_v62  ;;  %v1722_v54 = vadd.f32 1.0, %v1721_v45  ;;  %v3964_v63 = vld [vmem:[#allocation28_spill] sm:$0xff] }
 0x346   : > { %1923 = vmatprep.subr.mxu0 %v1874_v7  ;;  %v1739_v29 = vmul.f32 -0.5, %v3496_v21  ;;  %v1727_v24 = vadd.f32 1.0, %v3954_v49  ;;  %1993 = vmatpush1.msra.mxu1 %v1879_v23  ;;  %v1876_v14 = vsel %vm1668_vm9, %v3955_v42, %v3555_v6  ;;  %vm1667_vm11 = vcmp.gt.f32.partialorder %v3956_v58, 20.0  ;;  %v2349_v48 = vpop.eup %2348 }
 0x347   : > { %1924 = vmatpush1.msra.mxu0 %v1873_v34  ;;  %v1724_v31 = vand.u32 2147483647, %v3493_v56  ;;  %1994 = vmatprep.subr.mxu1 %v1876_v14  ;;  %v1875_v50 = vsel %vm1667_vm11, %v3957_v26, %v1859_v3  ;;  %v1720_v59 = vmul.f32 0.6931472, %v2349_v48  ;;  %v1723_v43 = vmul.f32 %v3493_v56, %v1722_v54 }
 0x348   : > { %2354 = vlog2.f32 %v1727_v24  ;;  %1995 = vmatpush1.msra.mxu1 %v1875_v50  ;;  %v1740_v52 = vadd.f32 1.0, %v1739_v29  ;;  %v1742_v61 = vand.u32 2147483647, %v3496_v21  ;;  %v1712_v6 = vmul.f32 -0.5, %v3945_v32 }
 0x349   : > { %vm1725_vm12 = vcmp.lt.f32.partialorder %v1724_v31, 0.0004427343  ;;  %vm1662_vm1 = vcmp.gt.f32.partialorder %v3958_v51, 20.0  ;;  %v1730_v55 = vmul.f32 -0.5, %v3954_v49  ;;  %v1715_v46 = vand.u32 2147483647, %v3945_v32 }
 0x34a   : > { %v1726_v8 = vsel %vm1725_vm12, %v1723_v43, %v1720_v59  ;;  %v1741_v22 = vmul.f32 %v3496_v21, %v1740_v52  ;;  %vm1743_vm13 = vcmp.lt.f32.partialorder %v1742_v61, 0.0004427343  ;;  %v1713_v56 = vadd.f32 1.0, %v1712_v6 }
 0x34b   : > { %v2351_v38 = vpop.eup %2350  ;;  %v1854_v35 = vmul.f32 0.01, %v1726_v8  ;;  %vm1664_vm14 = vcmp.gt.f32.partialorder %v3960_v10, 20.0  ;;  %v1731_v15 = vadd.f32 1.0, %v1730_v55  ;;  %v1733_v53 = vand.u32 2147483647, %v3954_v49 }
 0x34c   : > { %v1738_v18 = vmul.f32 0.6931472, %v2351_v38  ;;  %v1714_v21 = vmul.f32 %v3945_v32, %v1713_v56  ;;  %vm1716_vm0 = vcmp.lt.f32.partialorder %v1715_v46, 0.0004427343  ;;  %vm1661_vm2 = vcmp.gt.f32.partialorder %v3962_v20, 20.0  ;;  %v3966_v32 = vld [vmem:[#allocation29_spill] sm:$0xff] }
 0x34d   : > { %v1870_v41 = vsel %vm1662_vm1, %v3959_v40, %v1854_v35  ;;  %v1732_v17 = vmul.f32 %v3954_v49, %v1731_v15  ;;  %vm1734_vm3 = vcmp.lt.f32.partialorder %v1733_v53, 0.0004427343  ;;  %vm1663_vm4 = vcmp.gt.f32.partialorder %v3964_v63, 20.0 }
 0x34e   : > { %1925 = vmatprep.subr.mxu0 %v1870_v41  ;;  %v1744_v27 = vsel %vm1743_vm13, %v1741_v22, %v1738_v18  ;;  %vm3965_vm5 = vcmask 261120  }
 0x34f   : > { %v1856_v11 = vmul.f32 0.01, %v1744_v27  ;;  %vm3967_vm6 = vmmov %vm3965_vm5 }
 0x351   : > { %v1872_v25 = vsel %vm1664_vm14, %v3961_v30, %v1856_v11 }
 0x352   : > { %v2353_v57 = vpop.eup %2352  ;;  %1996 = vmatprep.subr.mxu1 %v1872_v25 }
 0x353   : > { %v1711_v36 = vmul.f32 0.6931472, %v2353_v57 }
 0x355   : > { %v2355_v5 = vpop.eup %2354  ;;  %v1717_v28 = vsel %vm1716_vm0, %v1714_v21, %v1711_v36 }
 0x356   : > { %v1853_v39 = vmul.f32 0.01, %v1717_v28  ;;  %v1729_v2 = vmul.f32 0.6931472, %v2355_v5 }
 0x358   : > { %v1869_v45 = vsel %vm1661_vm2, %v3963_v9, %v1853_v39  ;;  %v1735_v33 = vsel %vm1734_vm3, %v1732_v17, %v1729_v2 }
 0x359   : > { %1926 = vmatpush1.msra.mxu0 %v1869_v45  ;;  %v1855_v16 = vmul.f32 0.01, %v1735_v33 }
 0x35a   : > { %2146 = vmatmul.mubr.msk.f32.vlgmr.msra.gmra.mxu0 %vm3965_vm5, %v1885_v60 }
 0x35b   : > { %v1871_v37 = vsel %vm1663_vm4, %v3966_v32, %v1855_v16 }
 0x35c   : > { %1997 = vmatpush1.msra.mxu1 %v1871_v37 }
 0x35d   : > { %2147 = vmatmul.mubr.msk.f32.vlgmr.msra.gmra.mxu1 %vm3967_vm6, %v1885_v60 }
 0x41a   : > { %v1961_v4 = vpop.f32.mrf.mxu0 }
 0x41b   : > { %v1962_v47 = vadd.f32 %v1961_v4, %v1890_v44 }
 0x41c   : > { %v1963_v19 = vpop.f32.mrf.mxu0 }
 0x41d   : > { %2037 = vst [vmem:[%s334_s22] sm:$0x1f] %v1962_v47  ;;  %v2032_v62 = vpop.f32.mrf.mxu1  ;;  %v1964_v3 = vadd.f32 %v1963_v19, %v1890_v44 }
 0x41e   : > { %v2033_v1 = vadd.f32 %v2032_v62, %v1890_v44 }
 0x41f   : > { %2038 = vst [vmem:[%s334_s22 + $0x8] sm:$0x1f] %v1964_v3  ;;  %v2034_v7 = vpop.f32.mrf.mxu1 }
 0x420   : > { %2039 = vst [vmem:[%s334_s22 + $0x10] sm:$0x1f] %v2033_v1  ;;  %v2035_v13 = vadd.f32 %v2034_v7, %v1890_v44 }
 0x422   : > { %2040 = vst [vmem:[%s334_s22 + $0x18] sm:$0x1f] %v2035_v13 }
 0x423 PF: > { %s19_s30 = sadd.s32 1, %s2362_s30  }
 0x424   : > { %p16_p4 = scmp.ge.s32.totalorder %s19_s30, 4  }
 0x426   :  { %18 = sbr.rel (!%p16_p4) target bundleno = 1 (0x1), region = 86 }

</bundles_post_ra>
